<compile_context>
chip_gen: v7x
topology: tpu7x:2x2x1
jax: 0.10.0
libtpu: 0.0.40
codegen_flags: <defaults>
</compile_context>

<pallas_src>
import numpy as np
import jax
import jax.numpy as jnp
from jax.experimental import pallas as pl
from jax.experimental.pallas import tpu as pltpu


# ----------------------------- Pallas kernel ------------------------------

def lenet_fused_kernel(p1_ref, w_ref, b_ref, o_ref, a1_scr, x2_scr, xg_scr):
    """Whole LeNet forward for the full batch in a single kernel invocation."""
    B = o_ref.shape[1]          # batch size
    NP = a1_scr.shape[1]        # padded conv1 slab width (multiple of 128)
    n2 = x2_scr.shape[1]        # 136*B conv2 output columns (flat raster)
    f32, bf16 = jnp.float32, jnp.bfloat16

    # ---- conv1 (+ fused 2x2 max-pool + bias + ReLU) -------------------------
    # p1 holds the im2col patches of all 4 pooling offsets side by side (each
    # slab padded to a 128-lane multiple), so ONE matmul feeds a 2-level tree
    # max over aligned full-vreg slabs.  Bias commutes with the max.
    c_all = jnp.dot(w_ref[0:16, 0:75], p1_ref[...],
                    preferred_element_type=f32)                 # (16, 4*NP)
    c1 = jnp.maximum(jnp.maximum(c_all[:, 0 * NP:1 * NP], c_all[:, 1 * NP:2 * NP]),
                     jnp.maximum(c_all[:, 2 * NP:3 * NP], c_all[:, 3 * NP:4 * NP]))
    a1_scr[...] = jnp.maximum(c1 + b_ref[0:16, :], 0.0).astype(bf16)

    # ---- conv2 im2col in-kernel: 25 aligned 16-row copies -------------------
    # a1 is a flat (i*14+j)*B+b raster, so tap (dh,dw) of the 5x5 valid conv is
    # the lane-shifted slice starting at (dh*14+dw)*B.  Row blocks are full
    # 16-row bf16 sublane groups -> every store is aligned (no masked stores).
    for k in range(25):
        s = ((k // 5) * 14 + (k % 5)) * B
        x2_scr[16 * k:16 * k + 16, :] = a1_scr[:, s:s + n2]

    # ---- conv2: ONE (16,400)@(400,136B) matmul ------------------------------
    c2 = jnp.dot(w_ref[16:32, :], x2_scr[...],
                 preferred_element_type=f32) + b_ref[16:32, :]  # (16, 136*B)

    # ---- 2x2 max-pool + ReLU, entirely in vregs (no f32 scratch round trip) -
    n3 = 121 * B
    pooled = jnp.maximum(
        jnp.maximum(c2[:, 0:n3], c2[:, B:B + n3]),
        jnp.maximum(c2[:, 14 * B:14 * B + n3], c2[:, 15 * B:15 * B + n3]))
    pooled = jnp.maximum(pooled, 0.0).astype(bf16)              # (16, 121*B)

    # ---- gather the 25 pooled positions straight into the (400,B) fc1 layout.
    # fc1 weight columns were re-ordered on the host to (s, t, ci) so each copy
    # fills one aligned 16-row bf16 block.
    for st in range(25):
        c0 = (28 * (st // 5) + 2 * (st % 5)) * B
        xg_scr[16 * st:16 * st + 16, :] = pooled[:, c0:c0 + B]

    # ---- MLP head: fc1 -> relu -> fc2 -> relu -> fc3 ------------------------
    # TODO(synk): F.dropout / nn.Dropout2d treated as identity (eval-mode
    # semantics); training-mode RNG masking not implemented.
    h = jnp.dot(w_ref[32:152, :], xg_scr[...], preferred_element_type=f32)
    h = jnp.maximum(h + b_ref[32:152, :], 0.0)                  # (120, B)
    h = jnp.dot(w_ref[160:244, 0:120], h.astype(bf16),
                preferred_element_type=f32)
    h = jnp.maximum(h + b_ref[152:236, :], 0.0)                 # (84, B)
    o_ref[...] = (jnp.dot(w_ref[256:266, 0:84], h.astype(bf16),
                          preferred_element_type=f32) + b_ref[240:250, :])


# ------------------------------ JAX glue code ------------------------------

def conv1_patches(x, npad):
    """x: (B,3,32,32) f32 -> (75, 4*npad) bf16 im2col patches.

    Rows ordered (ci, dh, dw) to match conv1_w.reshape(6, 75).  The 4 pooling
    offsets (du, dv) are four lane slabs of width `npad` (a 128 multiple);
    within a slab, columns are the flat raster (i*14 + j)*B + b.
    """
    b = x.shape[0]
    taps = jnp.stack([x[:, :, dh:dh + 28, dw:dw + 28]
                      for dh in range(5) for dw in range(5)], axis=0)
    taps = taps.transpose(2, 0, 1, 3, 4).reshape(75, b, 28, 28)   # (ci,dh,dw)
    slabs = []
    for du in range(2):
        for dv in range(2):
            d = taps[:, :, du::2, dv::2]                          # (75,B,14,14)
            d = d.transpose(0, 2, 3, 1).reshape(75, 196 * b)      # cols (i,j,b)
            slabs.append(jnp.pad(d, ((0, 0), (0, npad - 196 * b))))
    return jnp.concatenate(slabs, axis=1).astype(jnp.bfloat16)    # (75, 4*npad)


@jax.jit
def lenet_forward(x, params):
    b = x.shape[0]
    npad = -(-196 * b // 128) * 128
    f32, bf16 = jnp.float32, jnp.bfloat16

    p1 = conv1_patches(x, npad)

    # One packed bf16 weight slab; every segment starts on a 16-row boundary.
    #   [  0: 16) conv1 (padded to 16 rows), cols [0:75)
    #   [ 16: 32) conv2 as (16, 400): col = (dh*5+dw)*16 + ci (10 zero pad cols)
    #   [ 32:152) fc1 with columns re-ordered to (s, t, ci)
    #   [160:244) fc2, cols [0:120)
    #   [256:266) fc3, cols [0:84)
    wts = jnp.zeros((272, 400), f32)
    wts = wts.at[0:6, 0:75].set(params['conv1_w'].reshape(6, 75))
    w2r = jnp.pad(params['conv2_w'].transpose(0, 2, 3, 1),
                  ((0, 0), (0, 0), (0, 0), (0, 10))).reshape(16, 400)
    wts = wts.at[16:32, :].set(w2r)
    wf1 = (params['fc1_w'].reshape(120, 16, 5, 5).transpose(0, 2, 3, 1)
           .reshape(120, 400))
    wts = wts.at[32:152, :].set(wf1)
    wts = wts.at[160:244, 0:120].set(params['fc2_w'])
    wts = wts.at[256:266, 0:84].set(params['fc3_w'])
    wts = wts.astype(bf16)

    # One packed f32 bias column; every segment starts on an 8-row boundary.
    bias = jnp.zeros((256, 1), f32)
    bias = bias.at[0:6, 0].set(params['conv1_b'])
    bias = bias.at[16:32, 0].set(params['conv2_b'])
    bias = bias.at[32:152, 0].set(params['fc1_b'])
    bias = bias.at[152:236, 0].set(params['fc2_b'])
    bias = bias.at[240:250, 0].set(params['fc3_b'])

    flops = 2 * (16 * 75 * 4 * npad + 16 * 400 * 136 * b
                 + (120 * 400 + 84 * 120 + 10 * 84) * b)
    bytes_accessed = 75 * 4 * npad * 2 + 272 * 400 * 2 + 256 * 4 + 10 * b * 4

    out = pl.pallas_call(
        lenet_fused_kernel,
        out_shape=jax.ShapeDtypeStruct((10, b), f32),
        scratch_shapes=[
            pltpu.VMEM((16, npad), bf16),       # conv1 pooled+relu activation
            pltpu.VMEM((400, 136 * b), bf16),   # conv2 im2col (25 x 16-row taps)
            pltpu.VMEM((400, b), bf16),         # gathered fc1 input, (s,t,ci) rows
        ],
        cost_estimate=pl.CostEstimate(flops=flops, transcendentals=0,
                                      bytes_accessed=bytes_accessed),
    )(p1, wts, bias)
    return out.T                                # (B, 10)


def lenet_reference(x, params):
    """Pure-JAX reference with the same bf16 rounding of matmul operands."""
    f32 = jnp.float32
    rd = lambda a: a.astype(jnp.bfloat16).astype(f32)

    def pool2(a):
        return jax.lax.reduce_window(a, -jnp.inf, jax.lax.max,
                                     (1, 1, 2, 2), (1, 1, 2, 2), 'VALID')

    y = jax.lax.conv_general_dilated(
        rd(x), rd(params['conv1_w']), (1, 1), 'VALID',
        dimension_numbers=('NCHW', 'OIHW', 'NCHW'))
    y = y + params['conv1_b'][None, :, None, None]
    y = jnp.maximum(pool2(y), 0.0)
    y = jax.lax.conv_general_dilated(
        rd(y), rd(params['conv2_w']), (1, 1), 'VALID',
        dimension_numbers=('NCHW', 'OIHW', 'NCHW'))
    y = y + params['conv2_b'][None, :, None, None]
    y = jnp.maximum(pool2(y), 0.0)
    h = rd(y.reshape(x.shape[0], 400))
    h = jnp.maximum(h @ rd(params['fc1_w']).T + params['fc1_b'], 0.0)
    h = jnp.maximum(rd(h) @ rd(params['fc2_w']).T + params['fc2_b'], 0.0)
    return rd(h) @ rd(params['fc3_w']).T + params['fc3_b']


def init_params(key):
    ks = jax.random.split(key, 10)

    def uinit(k, shape, fan_in):
        bound = 1.0 / np.sqrt(fan_in)
        return jax.random.uniform(k, shape, jnp.float32, -bound, bound)

    return dict(
        conv1_w=uinit(ks[0], (6, 3, 5, 5), 3 * 25),
        conv1_b=uinit(ks[1], (6,), 3 * 25),
        conv2_w=uinit(ks[2], (16, 6, 5, 5), 6 * 25),
        conv2_b=uinit(ks[3], (16,), 6 * 25),
        fc1_w=uinit(ks[4], (120, 400), 400),
        fc1_b=uinit(ks[5], (120,), 400),
        fc2_w=uinit(ks[6], (84, 120), 120),
        fc2_b=uinit(ks[7], (84,), 120),
        fc3_w=uinit(ks[8], (10, 84), 84),
        fc3_b=uinit(ks[9], (10,), 84),
    )


if __name__ == "__main__":
    key = jax.random.PRNGKey(0)
    pkey, xkey = jax.random.split(key)
    params = init_params(pkey)
    # LeNet as defined implies 3x32x32 inputs (16*5*5 flatten); batch=2.
    x = jax.random.normal(xkey, (2, 3, 32, 32), jnp.float32)

    out = jax.block_until_ready(lenet_forward(x, params))
    assert out.shape == (2, 10) and out.dtype == jnp.float32
    assert bool(jnp.all(jnp.isfinite(out)))

    ref = jax.block_until_ready(lenet_reference(x, params))
    np.testing.assert_allclose(np.asarray(out), np.asarray(ref),
                               rtol=2e-2, atol=2e-2)
    print("KERNEL_OK")
</pallas_src>

<mosaic_0001>
module attributes {stable_mosaic.version = 11 : i64} {
  func.func @lenet_fused_kernel(%arg0: memref<75x2048xbf16, #tpu.memory_space<vmem>>, %arg1: memref<272x400xbf16, #tpu.memory_space<vmem>>, %arg2: memref<256x1xf32, #tpu.memory_space<vmem>>, %arg3: memref<10x2xf32, #tpu.memory_space<vmem>>, %arg4: memref<16x512xbf16, #tpu.memory_space<vmem>>, %arg5: memref<400x272xbf16, #tpu.memory_space<vmem>>, %arg6: memref<400x2xbf16, #tpu.memory_space<vmem>>) attributes {dimension_semantics = [], scalar_prefetch = 0 : i64, scratch_operands = 3 : i64, tpu.core_type = #tpu.core_type<tc>} {
    %c0 = arith.constant 0 : index
    %c0_0 = arith.constant 0 : index
    %0 = vector.load %arg1[%c0, %c0_0] : memref<272x400xbf16, #tpu.memory_space<vmem>>, vector<16x75xbf16>
    %c0_1 = arith.constant 0 : index
    %c0_2 = arith.constant 0 : index
    %1 = vector.load %arg0[%c0_1, %c0_2] : memref<75x2048xbf16, #tpu.memory_space<vmem>>, vector<75x2048xbf16>
    %cst = arith.constant dense<0.000000e+00> : vector<16x2048xf32>
    %2 = tpu.matmul %0, %1, %cst {dimension_numbers = #tpu.dot_dimension_numbers<[1], [0], [0], [1], [0, 0, 1, 1], [], []>} : vector<16x75xbf16>, vector<75x2048xbf16>, vector<16x2048xf32> -> vector<16x2048xf32>
    %3 = vector.extract_strided_slice %2 {offsets = [0, 0], sizes = [16, 512], strides = [1, 1]} : vector<16x2048xf32> to vector<16x512xf32>
    %4 = vector.extract_strided_slice %2 {offsets = [0, 512], sizes = [16, 512], strides = [1, 1]} : vector<16x2048xf32> to vector<16x512xf32>
    %5 = arith.maximumf %3, %4 : vector<16x512xf32>
    %6 = vector.extract_strided_slice %2 {offsets = [0, 1024], sizes = [16, 512], strides = [1, 1]} : vector<16x2048xf32> to vector<16x512xf32>
    %7 = vector.extract_strided_slice %2 {offsets = [0, 1536], sizes = [16, 512], strides = [1, 1]} : vector<16x2048xf32> to vector<16x512xf32>
    %8 = arith.maximumf %6, %7 : vector<16x512xf32>
    %9 = arith.maximumf %5, %8 : vector<16x512xf32>
    %c0_3 = arith.constant 0 : index
    %c0_4 = arith.constant 0 : index
    %10 = vector.load %arg2[%c0_3, %c0_4] : memref<256x1xf32, #tpu.memory_space<vmem>>, vector<16x1xf32>
    %11 = vector.broadcast %10 : vector<16x1xf32> to vector<16x512xf32>
    %12 = arith.addf %9, %11 : vector<16x512xf32>
    %cst_5 = arith.constant 0.000000e+00 : f32
    %13 = vector.broadcast %cst_5 : f32 to vector<16x512xf32>
    %14 = arith.maximumf %12, %13 : vector<16x512xf32>
    %15 = arith.truncf %14 : vector<16x512xf32> to vector<16x512xbf16>
    %c0_6 = arith.constant 0 : index
    %c0_7 = arith.constant 0 : index
    %16 = vector.load %arg4[%c0_6, %c0_7] : memref<16x512xbf16, #tpu.memory_space<vmem>>, vector<16x512xbf16>
    tpu.vector_store %arg4[%c0_6, %c0_7], %15 {strides = array<i32>} : memref<16x512xbf16, #tpu.memory_space<vmem>>, vector<16x512xbf16>,
    %c0_8 = arith.constant 0 : index
    %c0_9 = arith.constant 0 : index
    %17 = vector.load %arg4[%c0_8, %c0_9] : memref<16x512xbf16, #tpu.memory_space<vmem>>, vector<16x272xbf16>
    %c0_10 = arith.constant 0 : index
    %c0_11 = arith.constant 0 : index
    %18 = vector.load %arg5[%c0_10, %c0_11] : memref<400x272xbf16, #tpu.memory_space<vmem>>, vector<16x272xbf16>
    tpu.vector_store %arg5[%c0_10, %c0_11], %17 {strides = array<i32>} : memref<400x272xbf16, #tpu.memory_space<vmem>>, vector<16x272xbf16>,
    %c0_12 = arith.constant 0 : index
    %c2 = arith.constant 2 : index
    %19 = vector.load %arg4[%c0_12, %c2] : memref<16x512xbf16, #tpu.memory_space<vmem>>, vector<16x272xbf16>
    %c16 = arith.constant 16 : index
    %c0_13 = arith.constant 0 : index
    %20 = vector.load %arg5[%c16, %c0_13] : memref<400x272xbf16, #tpu.memory_space<vmem>>, vector<16x272xbf16>
    tpu.vector_store %arg5[%c16, %c0_13], %19 {strides = array<i32>} : memref<400x272xbf16, #tpu.memory_space<vmem>>, vector<16x272xbf16>,
    %c0_14 = arith.constant 0 : index
    %c4 = arith.constant 4 : index
    %21 = vector.load %arg4[%c0_14, %c4] : memref<16x512xbf16, #tpu.memory_space<vmem>>, vector<16x272xbf16>
    %c32 = arith.constant 32 : index
    %c0_15 = arith.constant 0 : index
    %22 = vector.load %arg5[%c32, %c0_15] : memref<400x272xbf16, #tpu.memory_space<vmem>>, vector<16x272xbf16>
    tpu.vector_store %arg5[%c32, %c0_15], %21 {strides = array<i32>} : memref<400x272xbf16, #tpu.memory_space<vmem>>, vector<16x272xbf16>,
    %c0_16 = arith.constant 0 : index
    %c6 = arith.constant 6 : index
    %23 = vector.load %arg4[%c0_16, %c6] : memref<16x512xbf16, #tpu.memory_space<vmem>>, vector<16x272xbf16>
    %c48 = arith.constant 48 : index
    %c0_17 = arith.constant 0 : index
    %24 = vector.load %arg5[%c48, %c0_17] : memref<400x272xbf16, #tpu.memory_space<vmem>>, vector<16x272xbf16>
    tpu.vector_store %arg5[%c48, %c0_17], %23 {strides = array<i32>} : memref<400x272xbf16, #tpu.memory_space<vmem>>, vector<16x272xbf16>,
    %c0_18 = arith.constant 0 : index
    %c8 = arith.constant 8 : index
    %25 = vector.load %arg4[%c0_18, %c8] : memref<16x512xbf16, #tpu.memory_space<vmem>>, vector<16x272xbf16>
    %c64 = arith.constant 64 : index
    %c0_19 = arith.constant 0 : index
    %26 = vector.load %arg5[%c64, %c0_19] : memref<400x272xbf16, #tpu.memory_space<vmem>>, vector<16x272xbf16>
    tpu.vector_store %arg5[%c64, %c0_19], %25 {strides = array<i32>} : memref<400x272xbf16, #tpu.memory_space<vmem>>, vector<16x272xbf16>,
    %c0_20 = arith.constant 0 : index
    %c28 = arith.constant 28 : index
    %27 = vector.load %arg4[%c0_20, %c28] : memref<16x512xbf16, #tpu.memory_space<vmem>>, vector<16x272xbf16>
    %c80 = arith.constant 80 : index
    %c0_21 = arith.constant 0 : index
    %28 = vector.load %arg5[%c80, %c0_21] : memref<400x272xbf16, #tpu.memory_space<vmem>>, vector<16x272xbf16>
    tpu.vector_store %arg5[%c80, %c0_21], %27 {strides = array<i32>} : memref<400x272xbf16, #tpu.memory_space<vmem>>, vector<16x272xbf16>,
    %c0_22 = arith.constant 0 : index
    %c30 = arith.constant 30 : index
    %29 = vector.load %arg4[%c0_22, %c30] : memref<16x512xbf16, #tpu.memory_space<vmem>>, vector<16x272xbf16>
    %c96 = arith.constant 96 : index
    %c0_23 = arith.constant 0 : index
    %30 = vector.load %arg5[%c96, %c0_23] : memref<400x272xbf16, #tpu.memory_space<vmem>>, vector<16x272xbf16>
    tpu.vector_store %arg5[%c96, %c0_23], %29 {strides = array<i32>} : memref<400x272xbf16, #tpu.memory_space<vmem>>, vector<16x272xbf16>,
    %c0_24 = arith.constant 0 : index
    %c32_25 = arith.constant 32 : index
    %31 = vector.load %arg4[%c0_24, %c32_25] : memref<16x512xbf16, #tpu.memory_space<vmem>>, vector<16x272xbf16>
    %c112 = arith.constant 112 : index
    %c0_26 = arith.constant 0 : index
    %32 = vector.load %arg5[%c112, %c0_26] : memref<400x272xbf16, #tpu.memory_space<vmem>>, vector<16x272xbf16>
    tpu.vector_store %arg5[%c112, %c0_26], %31 {strides = array<i32>} : memref<400x272xbf16, #tpu.memory_space<vmem>>, vector<16x272xbf16>,
    %c0_27 = arith.constant 0 : index
    %c34 = arith.constant 34 : index
    %33 = vector.load %arg4[%c0_27, %c34] : memref<16x512xbf16, #tpu.memory_space<vmem>>, vector<16x272xbf16>
    %c128 = arith.constant 128 : index
    %c0_28 = arith.constant 0 : index
    %34 = vector.load %arg5[%c128, %c0_28] : memref<400x272xbf16, #tpu.memory_space<vmem>>, vector<16x272xbf16>
    tpu.vector_store %arg5[%c128, %c0_28], %33 {strides = array<i32>} : memref<400x272xbf16, #tpu.memory_space<vmem>>, vector<16x272xbf16>,
    %c0_29 = arith.constant 0 : index
    %c36 = arith.constant 36 : index
    %35 = vector.load %arg4[%c0_29, %c36] : memref<16x512xbf16, #tpu.memory_space<vmem>>, vector<16x272xbf16>
    %c144 = arith.constant 144 : index
    %c0_30 = arith.constant 0 : index
    %36 = vector.load %arg5[%c144, %c0_30] : memref<400x272xbf16, #tpu.memory_space<vmem>>, vector<16x272xbf16>
    tpu.vector_store %arg5[%c144, %c0_30], %35 {strides = array<i32>} : memref<400x272xbf16, #tpu.memory_space<vmem>>, vector<16x272xbf16>,
    %c0_31 = arith.constant 0 : index
    %c56 = arith.constant 56 : index
    %37 = vector.load %arg4[%c0_31, %c56] : memref<16x512xbf16, #tpu.memory_space<vmem>>, vector<16x272xbf16>
    %c160 = arith.constant 160 : index
    %c0_32 = arith.constant 0 : index
    %38 = vector.load %arg5[%c160, %c0_32] : memref<400x272xbf16, #tpu.memory_space<vmem>>, vector<16x272xbf16>
    tpu.vector_store %arg5[%c160, %c0_32], %37 {strides = array<i32>} : memref<400x272xbf16, #tpu.memory_space<vmem>>, vector<16x272xbf16>,
    %c0_33 = arith.constant 0 : index
    %c58 = arith.constant 58 : index
    %39 = vector.load %arg4[%c0_33, %c58] : memref<16x512xbf16, #tpu.memory_space<vmem>>, vector<16x272xbf16>
    %c176 = arith.constant 176 : index
    %c0_34 = arith.constant 0 : index
    %40 = vector.load %arg5[%c176, %c0_34] : memref<400x272xbf16, #tpu.memory_space<vmem>>, vector<16x272xbf16>
    tpu.vector_store %arg5[%c176, %c0_34], %39 {strides = array<i32>} : memref<400x272xbf16, #tpu.memory_space<vmem>>, vector<16x272xbf16>,
    %c0_35 = arith.constant 0 : index
    %c60 = arith.constant 60 : index
    %41 = vector.load %arg4[%c0_35, %c60] : memref<16x512xbf16, #tpu.memory_space<vmem>>, vector<16x272xbf16>
    %c192 = arith.constant 192 : index
    %c0_36 = arith.constant 0 : index
    %42 = vector.load %arg5[%c192, %c0_36] : memref<400x272xbf16, #tpu.memory_space<vmem>>, vector<16x272xbf16>
    tpu.vector_store %arg5[%c192, %c0_36], %41 {strides = array<i32>} : memref<400x272xbf16, #tpu.memory_space<vmem>>, vector<16x272xbf16>,
    %c0_37 = arith.constant 0 : index
    %c62 = arith.constant 62 : index
    %43 = vector.load %arg4[%c0_37, %c62] : memref<16x512xbf16, #tpu.memory_space<vmem>>, vector<16x272xbf16>
    %c208 = arith.constant 208 : index
    %c0_38 = arith.constant 0 : index
    %44 = vector.load %arg5[%c208, %c0_38] : memref<400x272xbf16, #tpu.memory_space<vmem>>, vector<16x272xbf16>
    tpu.vector_store %arg5[%c208, %c0_38], %43 {strides = array<i32>} : memref<400x272xbf16, #tpu.memory_space<vmem>>, vector<16x272xbf16>,
    %c0_39 = arith.constant 0 : index
    %c64_40 = arith.constant 64 : index
    %45 = vector.load %arg4[%c0_39, %c64_40] : memref<16x512xbf16, #tpu.memory_space<vmem>>, vector<16x272xbf16>
    %c224 = arith.constant 224 : index
    %c0_41 = arith.constant 0 : index
    %46 = vector.load %arg5[%c224, %c0_41] : memref<400x272xbf16, #tpu.memory_space<vmem>>, vector<16x272xbf16>
    tpu.vector_store %arg5[%c224, %c0_41], %45 {strides = array<i32>} : memref<400x272xbf16, #tpu.memory_space<vmem>>, vector<16x272xbf16>,
    %c0_42 = arith.constant 0 : index
    %c84 = arith.constant 84 : index
    %47 = vector.load %arg4[%c0_42, %c84] : memref<16x512xbf16, #tpu.memory_space<vmem>>, vector<16x272xbf16>
    %c240 = arith.constant 240 : index
    %c0_43 = arith.constant 0 : index
    %48 = vector.load %arg5[%c240, %c0_43] : memref<400x272xbf16, #tpu.memory_space<vmem>>, vector<16x272xbf16>
    tpu.vector_store %arg5[%c240, %c0_43], %47 {strides = array<i32>} : memref<400x272xbf16, #tpu.memory_space<vmem>>, vector<16x272xbf16>,
    %c0_44 = arith.constant 0 : index
    %c86 = arith.constant 86 : index
    %49 = vector.load %arg4[%c0_44, %c86] : memref<16x512xbf16, #tpu.memory_space<vmem>>, vector<16x272xbf16>
    %c256 = arith.constant 256 : index
    %c0_45 = arith.constant 0 : index
    %50 = vector.load %arg5[%c256, %c0_45] : memref<400x272xbf16, #tpu.memory_space<vmem>>, vector<16x272xbf16>
    tpu.vector_store %arg5[%c256, %c0_45], %49 {strides = array<i32>} : memref<400x272xbf16, #tpu.memory_space<vmem>>, vector<16x272xbf16>,
    %c0_46 = arith.constant 0 : index
    %c88 = arith.constant 88 : index
    %51 = vector.load %arg4[%c0_46, %c88] : memref<16x512xbf16, #tpu.memory_space<vmem>>, vector<16x272xbf16>
    %c272 = arith.constant 272 : index
    %c0_47 = arith.constant 0 : index
    %52 = vector.load %arg5[%c272, %c0_47] : memref<400x272xbf16, #tpu.memory_space<vmem>>, vector<16x272xbf16>
    tpu.vector_store %arg5[%c272, %c0_47], %51 {strides = array<i32>} : memref<400x272xbf16, #tpu.memory_space<vmem>>, vector<16x272xbf16>,
    %c0_48 = arith.constant 0 : index
    %c90 = arith.constant 90 : index
    %53 = vector.load %arg4[%c0_48, %c90] : memref<16x512xbf16, #tpu.memory_space<vmem>>, vector<16x272xbf16>
    %c288 = arith.constant 288 : index
    %c0_49 = arith.constant 0 : index
    %54 = vector.load %arg5[%c288, %c0_49] : memref<400x272xbf16, #tpu.memory_space<vmem>>, vector<16x272xbf16>
    tpu.vector_store %arg5[%c288, %c0_49], %53 {strides = array<i32>} : memref<400x272xbf16, #tpu.memory_space<vmem>>, vector<16x272xbf16>,
    %c0_50 = arith.constant 0 : index
    %c92 = arith.constant 92 : index
    %55 = vector.load %arg4[%c0_50, %c92] : memref<16x512xbf16, #tpu.memory_space<vmem>>, vector<16x272xbf16>
    %c304 = arith.constant 304 : index
    %c0_51 = arith.constant 0 : index
    %56 = vector.load %arg5[%c304, %c0_51] : memref<400x272xbf16, #tpu.memory_space<vmem>>, vector<16x272xbf16>
    tpu.vector_store %arg5[%c304, %c0_51], %55 {strides = array<i32>} : memref<400x272xbf16, #tpu.memory_space<vmem>>, vector<16x272xbf16>,
    %c0_52 = arith.constant 0 : index
    %c112_53 = arith.constant 112 : index
    %57 = vector.load %arg4[%c0_52, %c112_53] : memref<16x512xbf16, #tpu.memory_space<vmem>>, vector<16x272xbf16>
    %c320 = arith.constant 320 : index
    %c0_54 = arith.constant 0 : index
    %58 = vector.load %arg5[%c320, %c0_54] : memref<400x272xbf16, #tpu.memory_space<vmem>>, vector<16x272xbf16>
    tpu.vector_store %arg5[%c320, %c0_54], %57 {strides = array<i32>} : memref<400x272xbf16, #tpu.memory_space<vmem>>, vector<16x272xbf16>,
    %c0_55 = arith.constant 0 : index
    %c114 = arith.constant 114 : index
    %59 = vector.load %arg4[%c0_55, %c114] : memref<16x512xbf16, #tpu.memory_space<vmem>>, vector<16x272xbf16>
    %c336 = arith.constant 336 : index
    %c0_56 = arith.constant 0 : index
    %60 = vector.load %arg5[%c336, %c0_56] : memref<400x272xbf16, #tpu.memory_space<vmem>>, vector<16x272xbf16>
    tpu.vector_store %arg5[%c336, %c0_56], %59 {strides = array<i32>} : memref<400x272xbf16, #tpu.memory_space<vmem>>, vector<16x272xbf16>,
    %c0_57 = arith.constant 0 : index
    %c116 = arith.constant 116 : index
    %61 = vector.load %arg4[%c0_57, %c116] : memref<16x512xbf16, #tpu.memory_space<vmem>>, vector<16x272xbf16>
    %c352 = arith.constant 352 : index
    %c0_58 = arith.constant 0 : index
    %62 = vector.load %arg5[%c352, %c0_58] : memref<400x272xbf16, #tpu.memory_space<vmem>>, vector<16x272xbf16>
    tpu.vector_store %arg5[%c352, %c0_58], %61 {strides = array<i32>} : memref<400x272xbf16, #tpu.memory_space<vmem>>, vector<16x272xbf16>,
    %c0_59 = arith.constant 0 : index
    %c118 = arith.constant 118 : index
    %63 = vector.load %arg4[%c0_59, %c118] : memref<16x512xbf16, #tpu.memory_space<vmem>>, vector<16x272xbf16>
    %c368 = arith.constant 368 : index
    %c0_60 = arith.constant 0 : index
    %64 = vector.load %arg5[%c368, %c0_60] : memref<400x272xbf16, #tpu.memory_space<vmem>>, vector<16x272xbf16>
    tpu.vector_store %arg5[%c368, %c0_60], %63 {strides = array<i32>} : memref<400x272xbf16, #tpu.memory_space<vmem>>, vector<16x272xbf16>,
    %c0_61 = arith.constant 0 : index
    %c120 = arith.constant 120 : index
    %65 = vector.load %arg4[%c0_61, %c120] : memref<16x512xbf16, #tpu.memory_space<vmem>>, vector<16x272xbf16>
    %c384 = arith.constant 384 : index
    %c0_62 = arith.constant 0 : index
    %66 = vector.load %arg5[%c384, %c0_62] : memref<400x272xbf16, #tpu.memory_space<vmem>>, vector<16x272xbf16>
    tpu.vector_store %arg5[%c384, %c0_62], %65 {strides = array<i32>} : memref<400x272xbf16, #tpu.memory_space<vmem>>, vector<16x272xbf16>,
    %c16_63 = arith.constant 16 : index
    %c0_64 = arith.constant 0 : index
    %67 = vector.load %arg1[%c16_63, %c0_64] : memref<272x400xbf16, #tpu.memory_space<vmem>>, vector<16x400xbf16>
    %c0_65 = arith.constant 0 : index
    %c0_66 = arith.constant 0 : index
    %68 = vector.load %arg5[%c0_65, %c0_66] : memref<400x272xbf16, #tpu.memory_space<vmem>>, vector<400x272xbf16>
    %cst_67 = arith.constant dense<0.000000e+00> : vector<16x272xf32>
    %69 = tpu.matmul %67, %68, %cst_67 {dimension_numbers = #tpu.dot_dimension_numbers<[1], [0], [0], [1], [0, 0, 1, 1], [], []>} : vector<16x400xbf16>, vector<400x272xbf16>, vector<16x272xf32> -> vector<16x272xf32>
    %c16_68 = arith.constant 16 : index
    %c0_69 = arith.constant 0 : index
    %70 = vector.load %arg2[%c16_68, %c0_69] : memref<256x1xf32, #tpu.memory_space<vmem>>, vector<16x1xf32>
    %71 = vector.broadcast %70 : vector<16x1xf32> to vector<16x272xf32>
    %72 = arith.addf %69, %71 : vector<16x272xf32>
    %73 = vector.extract_strided_slice %72 {offsets = [0, 0], sizes = [16, 242], strides = [1, 1]} : vector<16x272xf32> to vector<16x242xf32>
    %74 = vector.extract_strided_slice %72 {offsets = [0, 2], sizes = [16, 242], strides = [1, 1]} : vector<16x272xf32> to vector<16x242xf32>
    %75 = arith.maximumf %73, %74 : vector<16x242xf32>
    %76 = vector.extract_strided_slice %72 {offsets = [0, 28], sizes = [16, 242], strides = [1, 1]} : vector<16x272xf32> to vector<16x242xf32>
    %77 = vector.extract_strided_slice %72 {offsets = [0, 30], sizes = [16, 242], strides = [1, 1]} : vector<16x272xf32> to vector<16x242xf32>
    %78 = arith.maximumf %76, %77 : vector<16x242xf32>
    %79 = arith.maximumf %75, %78 : vector<16x242xf32>
    %cst_70 = arith.constant 0.000000e+00 : f32
    %80 = vector.broadcast %cst_70 : f32 to vector<16x242xf32>
    %81 = arith.maximumf %79, %80 : vector<16x242xf32>
    %82 = arith.truncf %81 : vector<16x242xf32> to vector<16x242xbf16>
    %83 = vector.extract_strided_slice %82 {offsets = [0, 0], sizes = [16, 2], strides = [1, 1]} : vector<16x242xbf16> to vector<16x2xbf16>
    %c0_71 = arith.constant 0 : index
    %c0_72 = arith.constant 0 : index
    %84 = vector.load %arg6[%c0_71, %c0_72] : memref<400x2xbf16, #tpu.memory_space<vmem>>, vector<16x2xbf16>
    tpu.vector_store %arg6[%c0_71, %c0_72], %83 {strides = array<i32>} : memref<400x2xbf16, #tpu.memory_space<vmem>>, vector<16x2xbf16>,
    %85 = vector.extract_strided_slice %82 {offsets = [0, 4], sizes = [16, 2], strides = [1, 1]} : vector<16x242xbf16> to vector<16x2xbf16>
    %c16_73 = arith.constant 16 : index
    %c0_74 = arith.constant 0 : index
    %86 = vector.load %arg6[%c16_73, %c0_74] : memref<400x2xbf16, #tpu.memory_space<vmem>>, vector<16x2xbf16>
    tpu.vector_store %arg6[%c16_73, %c0_74], %85 {strides = array<i32>} : memref<400x2xbf16, #tpu.memory_space<vmem>>, vector<16x2xbf16>,
    %87 = vector.extract_strided_slice %82 {offsets = [0, 8], sizes = [16, 2], strides = [1, 1]} : vector<16x242xbf16> to vector<16x2xbf16>
    %c32_75 = arith.constant 32 : index
    %c0_76 = arith.constant 0 : index
    %88 = vector.load %arg6[%c32_75, %c0_76] : memref<400x2xbf16, #tpu.memory_space<vmem>>, vector<16x2xbf16>
    tpu.vector_store %arg6[%c32_75, %c0_76], %87 {strides = array<i32>} : memref<400x2xbf16, #tpu.memory_space<vmem>>, vector<16x2xbf16>,
    %89 = vector.extract_strided_slice %82 {offsets = [0, 12], sizes = [16, 2], strides = [1, 1]} : vector<16x242xbf16> to vector<16x2xbf16>
    %c48_77 = arith.constant 48 : index
    %c0_78 = arith.constant 0 : index
    %90 = vector.load %arg6[%c48_77, %c0_78] : memref<400x2xbf16, #tpu.memory_space<vmem>>, vector<16x2xbf16>
    tpu.vector_store %arg6[%c48_77, %c0_78], %89 {strides = array<i32>} : memref<400x2xbf16, #tpu.memory_space<vmem>>, vector<16x2xbf16>,
    %91 = vector.extract_strided_slice %82 {offsets = [0, 16], sizes = [16, 2], strides = [1, 1]} : vector<16x242xbf16> to vector<16x2xbf16>
    %c64_79 = arith.constant 64 : index
    %c0_80 = arith.constant 0 : index
    %92 = vector.load %arg6[%c64_79, %c0_80] : memref<400x2xbf16, #tpu.memory_space<vmem>>, vector<16x2xbf16>
    tpu.vector_store %arg6[%c64_79, %c0_80], %91 {strides = array<i32>} : memref<400x2xbf16, #tpu.memory_space<vmem>>, vector<16x2xbf16>,
    %93 = vector.extract_strided_slice %82 {offsets = [0, 56], sizes = [16, 2], strides = [1, 1]} : vector<16x242xbf16> to vector<16x2xbf16>
    %c80_81 = arith.constant 80 : index
    %c0_82 = arith.constant 0 : index
    %94 = vector.load %arg6[%c80_81, %c0_82] : memref<400x2xbf16, #tpu.memory_space<vmem>>, vector<16x2xbf16>
    tpu.vector_store %arg6[%c80_81, %c0_82], %93 {strides = array<i32>} : memref<400x2xbf16, #tpu.memory_space<vmem>>, vector<16x2xbf16>,
    %95 = vector.extract_strided_slice %82 {offsets = [0, 60], sizes = [16, 2], strides = [1, 1]} : vector<16x242xbf16> to vector<16x2xbf16>
    %c96_83 = arith.constant 96 : index
    %c0_84 = arith.constant 0 : index
    %96 = vector.load %arg6[%c96_83, %c0_84] : memref<400x2xbf16, #tpu.memory_space<vmem>>, vector<16x2xbf16>
    tpu.vector_store %arg6[%c96_83, %c0_84], %95 {strides = array<i32>} : memref<400x2xbf16, #tpu.memory_space<vmem>>, vector<16x2xbf16>,
    %97 = vector.extract_strided_slice %82 {offsets = [0, 64], sizes = [16, 2], strides = [1, 1]} : vector<16x242xbf16> to vector<16x2xbf16>
    %c112_85 = arith.constant 112 : index
    %c0_86 = arith.constant 0 : index
    %98 = vector.load %arg6[%c112_85, %c0_86] : memref<400x2xbf16, #tpu.memory_space<vmem>>, vector<16x2xbf16>
    tpu.vector_store %arg6[%c112_85, %c0_86], %97 {strides = array<i32>} : memref<400x2xbf16, #tpu.memory_space<vmem>>, vector<16x2xbf16>,
    %99 = vector.extract_strided_slice %82 {offsets = [0, 68], sizes = [16, 2], strides = [1, 1]} : vector<16x242xbf16> to vector<16x2xbf16>
    %c128_87 = arith.constant 128 : index
    %c0_88 = arith.constant 0 : index
    %100 = vector.load %arg6[%c128_87, %c0_88] : memref<400x2xbf16, #tpu.memory_space<vmem>>, vector<16x2xbf16>
    tpu.vector_store %arg6[%c128_87, %c0_88], %99 {strides = array<i32>} : memref<400x2xbf16, #tpu.memory_space<vmem>>, vector<16x2xbf16>,
    %101 = vector.extract_strided_slice %82 {offsets = [0, 72], sizes = [16, 2], strides = [1, 1]} : vector<16x242xbf16> to vector<16x2xbf16>
    %c144_89 = arith.constant 144 : index
    %c0_90 = arith.constant 0 : index
    %102 = vector.load %arg6[%c144_89, %c0_90] : memref<400x2xbf16, #tpu.memory_space<vmem>>, vector<16x2xbf16>
    tpu.vector_store %arg6[%c144_89, %c0_90], %101 {strides = array<i32>} : memref<400x2xbf16, #tpu.memory_space<vmem>>, vector<16x2xbf16>,
    %103 = vector.extract_strided_slice %82 {offsets = [0, 112], sizes = [16, 2], strides = [1, 1]} : vector<16x242xbf16> to vector<16x2xbf16>
    %c160_91 = arith.constant 160 : index
    %c0_92 = arith.constant 0 : index
    %104 = vector.load %arg6[%c160_91, %c0_92] : memref<400x2xbf16, #tpu.memory_space<vmem>>, vector<16x2xbf16>
    tpu.vector_store %arg6[%c160_91, %c0_92], %103 {strides = array<i32>} : memref<400x2xbf16, #tpu.memory_space<vmem>>, vector<16x2xbf16>,
    %105 = vector.extract_strided_slice %82 {offsets = [0, 116], sizes = [16, 2], strides = [1, 1]} : vector<16x242xbf16> to vector<16x2xbf16>
    %c176_93 = arith.constant 176 : index
    %c0_94 = arith.constant 0 : index
    %106 = vector.load %arg6[%c176_93, %c0_94] : memref<400x2xbf16, #tpu.memory_space<vmem>>, vector<16x2xbf16>
    tpu.vector_store %arg6[%c176_93, %c0_94], %105 {strides = array<i32>} : memref<400x2xbf16, #tpu.memory_space<vmem>>, vector<16x2xbf16>,
    %107 = vector.extract_strided_slice %82 {offsets = [0, 120], sizes = [16, 2], strides = [1, 1]} : vector<16x242xbf16> to vector<16x2xbf16>
    %c192_95 = arith.constant 192 : index
    %c0_96 = arith.constant 0 : index
    %108 = vector.load %arg6[%c192_95, %c0_96] : memref<400x2xbf16, #tpu.memory_space<vmem>>, vector<16x2xbf16>
    tpu.vector_store %arg6[%c192_95, %c0_96], %107 {strides = array<i32>} : memref<400x2xbf16, #tpu.memory_space<vmem>>, vector<16x2xbf16>,
    %109 = vector.extract_strided_slice %82 {offsets = [0, 124], sizes = [16, 2], strides = [1, 1]} : vector<16x242xbf16> to vector<16x2xbf16>
    %c208_97 = arith.constant 208 : index
    %c0_98 = arith.constant 0 : index
    %110 = vector.load %arg6[%c208_97, %c0_98] : memref<400x2xbf16, #tpu.memory_space<vmem>>, vector<16x2xbf16>
    tpu.vector_store %arg6[%c208_97, %c0_98], %109 {strides = array<i32>} : memref<400x2xbf16, #tpu.memory_space<vmem>>, vector<16x2xbf16>,
    %111 = vector.extract_strided_slice %82 {offsets = [0, 128], sizes = [16, 2], strides = [1, 1]} : vector<16x242xbf16> to vector<16x2xbf16>
    %c224_99 = arith.constant 224 : index
    %c0_100 = arith.constant 0 : index
    %112 = vector.load %arg6[%c224_99, %c0_100] : memref<400x2xbf16, #tpu.memory_space<vmem>>, vector<16x2xbf16>
    tpu.vector_store %arg6[%c224_99, %c0_100], %111 {strides = array<i32>} : memref<400x2xbf16, #tpu.memory_space<vmem>>, vector<16x2xbf16>,
    %113 = vector.extract_strided_slice %82 {offsets = [0, 168], sizes = [16, 2], strides = [1, 1]} : vector<16x242xbf16> to vector<16x2xbf16>
    %c240_101 = arith.constant 240 : index
    %c0_102 = arith.constant 0 : index
    %114 = vector.load %arg6[%c240_101, %c0_102] : memref<400x2xbf16, #tpu.memory_space<vmem>>, vector<16x2xbf16>
    tpu.vector_store %arg6[%c240_101, %c0_102], %113 {strides = array<i32>} : memref<400x2xbf16, #tpu.memory_space<vmem>>, vector<16x2xbf16>,
    %115 = vector.extract_strided_slice %82 {offsets = [0, 172], sizes = [16, 2], strides = [1, 1]} : vector<16x242xbf16> to vector<16x2xbf16>
    %c256_103 = arith.constant 256 : index
    %c0_104 = arith.constant 0 : index
    %116 = vector.load %arg6[%c256_103, %c0_104] : memref<400x2xbf16, #tpu.memory_space<vmem>>, vector<16x2xbf16>
    tpu.vector_store %arg6[%c256_103, %c0_104], %115 {strides = array<i32>} : memref<400x2xbf16, #tpu.memory_space<vmem>>, vector<16x2xbf16>,
    %117 = vector.extract_strided_slice %82 {offsets = [0, 176], sizes = [16, 2], strides = [1, 1]} : vector<16x242xbf16> to vector<16x2xbf16>
    %c272_105 = arith.constant 272 : index
    %c0_106 = arith.constant 0 : index
    %118 = vector.load %arg6[%c272_105, %c0_106] : memref<400x2xbf16, #tpu.memory_space<vmem>>, vector<16x2xbf16>
    tpu.vector_store %arg6[%c272_105, %c0_106], %117 {strides = array<i32>} : memref<400x2xbf16, #tpu.memory_space<vmem>>, vector<16x2xbf16>,
    %119 = vector.extract_strided_slice %82 {offsets = [0, 180], sizes = [16, 2], strides = [1, 1]} : vector<16x242xbf16> to vector<16x2xbf16>
    %c288_107 = arith.constant 288 : index
    %c0_108 = arith.constant 0 : index
    %120 = vector.load %arg6[%c288_107, %c0_108] : memref<400x2xbf16, #tpu.memory_space<vmem>>, vector<16x2xbf16>
    tpu.vector_store %arg6[%c288_107, %c0_108], %119 {strides = array<i32>} : memref<400x2xbf16, #tpu.memory_space<vmem>>, vector<16x2xbf16>,
    %121 = vector.extract_strided_slice %82 {offsets = [0, 184], sizes = [16, 2], strides = [1, 1]} : vector<16x242xbf16> to vector<16x2xbf16>
    %c304_109 = arith.constant 304 : index
    %c0_110 = arith.constant 0 : index
    %122 = vector.load %arg6[%c304_109, %c0_110] : memref<400x2xbf16, #tpu.memory_space<vmem>>, vector<16x2xbf16>
    tpu.vector_store %arg6[%c304_109, %c0_110], %121 {strides = array<i32>} : memref<400x2xbf16, #tpu.memory_space<vmem>>, vector<16x2xbf16>,
    %123 = vector.extract_strided_slice %82 {offsets = [0, 224], sizes = [16, 2], strides = [1, 1]} : vector<16x242xbf16> to vector<16x2xbf16>
    %c320_111 = arith.constant 320 : index
    %c0_112 = arith.constant 0 : index
    %124 = vector.load %arg6[%c320_111, %c0_112] : memref<400x2xbf16, #tpu.memory_space<vmem>>, vector<16x2xbf16>
    tpu.vector_store %arg6[%c320_111, %c0_112], %123 {strides = array<i32>} : memref<400x2xbf16, #tpu.memory_space<vmem>>, vector<16x2xbf16>,
    %125 = vector.extract_strided_slice %82 {offsets = [0, 228], sizes = [16, 2], strides = [1, 1]} : vector<16x242xbf16> to vector<16x2xbf16>
    %c336_113 = arith.constant 336 : index
    %c0_114 = arith.constant 0 : index
    %126 = vector.load %arg6[%c336_113, %c0_114] : memref<400x2xbf16, #tpu.memory_space<vmem>>, vector<16x2xbf16>
    tpu.vector_store %arg6[%c336_113, %c0_114], %125 {strides = array<i32>} : memref<400x2xbf16, #tpu.memory_space<vmem>>, vector<16x2xbf16>,
    %127 = vector.extract_strided_slice %82 {offsets = [0, 232], sizes = [16, 2], strides = [1, 1]} : vector<16x242xbf16> to vector<16x2xbf16>
    %c352_115 = arith.constant 352 : index
    %c0_116 = arith.constant 0 : index
    %128 = vector.load %arg6[%c352_115, %c0_116] : memref<400x2xbf16, #tpu.memory_space<vmem>>, vector<16x2xbf16>
    tpu.vector_store %arg6[%c352_115, %c0_116], %127 {strides = array<i32>} : memref<400x2xbf16, #tpu.memory_space<vmem>>, vector<16x2xbf16>,
    %129 = vector.extract_strided_slice %82 {offsets = [0, 236], sizes = [16, 2], strides = [1, 1]} : vector<16x242xbf16> to vector<16x2xbf16>
    %c368_117 = arith.constant 368 : index
    %c0_118 = arith.constant 0 : index
    %130 = vector.load %arg6[%c368_117, %c0_118] : memref<400x2xbf16, #tpu.memory_space<vmem>>, vector<16x2xbf16>
    tpu.vector_store %arg6[%c368_117, %c0_118], %129 {strides = array<i32>} : memref<400x2xbf16, #tpu.memory_space<vmem>>, vector<16x2xbf16>,
    %131 = vector.extract_strided_slice %82 {offsets = [0, 240], sizes = [16, 2], strides = [1, 1]} : vector<16x242xbf16> to vector<16x2xbf16>
    %c384_119 = arith.constant 384 : index
    %c0_120 = arith.constant 0 : index
    %132 = vector.load %arg6[%c384_119, %c0_120] : memref<400x2xbf16, #tpu.memory_space<vmem>>, vector<16x2xbf16>
    tpu.vector_store %arg6[%c384_119, %c0_120], %131 {strides = array<i32>} : memref<400x2xbf16, #tpu.memory_space<vmem>>, vector<16x2xbf16>,
    %c32_121 = arith.constant 32 : index
    %c0_122 = arith.constant 0 : index
    %133 = vector.load %arg1[%c32_121, %c0_122] : memref<272x400xbf16, #tpu.memory_space<vmem>>, vector<120x400xbf16>
    %c0_123 = arith.constant 0 : index
    %c0_124 = arith.constant 0 : index
    %134 = vector.load %arg6[%c0_123, %c0_124] : memref<400x2xbf16, #tpu.memory_space<vmem>>, vector<400x2xbf16>
    %cst_125 = arith.constant dense<0.000000e+00> : vector<120x2xf32>
    %135 = tpu.matmul %133, %134, %cst_125 {dimension_numbers = #tpu.dot_dimension_numbers<[1], [0], [0], [1], [0, 0, 1, 1], [], []>} : vector<120x400xbf16>, vector<400x2xbf16>, vector<120x2xf32> -> vector<120x2xf32>
    %c32_126 = arith.constant 32 : index
    %c0_127 = arith.constant 0 : index
    %136 = vector.load %arg2[%c32_126, %c0_127] : memref<256x1xf32, #tpu.memory_space<vmem>>, vector<120x1xf32>
    %137 = vector.broadcast %136 : vector<120x1xf32> to vector<120x2xf32>
    %138 = arith.addf %135, %137 : vector<120x2xf32>
    %cst_128 = arith.constant 0.000000e+00 : f32
    %139 = vector.broadcast %cst_128 : f32 to vector<120x2xf32>
    %140 = arith.maximumf %138, %139 : vector<120x2xf32>
    %c160_129 = arith.constant 160 : index
    %c0_130 = arith.constant 0 : index
    %141 = vector.load %arg1[%c160_129, %c0_130] : memref<272x400xbf16, #tpu.memory_space<vmem>>, vector<84x120xbf16>
    %142 = arith.truncf %140 : vector<120x2xf32> to vector<120x2xbf16>
    %cst_131 = arith.constant dense<0.000000e+00> : vector<84x2xf32>
    %143 = tpu.matmul %141, %142, %cst_131 {dimension_numbers = #tpu.dot_dimension_numbers<[1], [0], [0], [1], [0, 0, 1, 1], [], []>} : vector<84x120xbf16>, vector<120x2xbf16>, vector<84x2xf32> -> vector<84x2xf32>
    %c152 = arith.constant 152 : index
    %c0_132 = arith.constant 0 : index
    %144 = vector.load %arg2[%c152, %c0_132] : memref<256x1xf32, #tpu.memory_space<vmem>>, vector<84x1xf32>
    %145 = vector.broadcast %144 : vector<84x1xf32> to vector<84x2xf32>
    %146 = arith.addf %143, %145 : vector<84x2xf32>
    %cst_133 = arith.constant 0.000000e+00 : f32
    %147 = vector.broadcast %cst_133 : f32 to vector<84x2xf32>
    %148 = arith.maximumf %146, %147 : vector<84x2xf32>
    %c256_134 = arith.constant 256 : index
    %c0_135 = arith.constant 0 : index
    %149 = vector.load %arg1[%c256_134, %c0_135] : memref<272x400xbf16, #tpu.memory_space<vmem>>, vector<10x84xbf16>
    %150 = arith.truncf %148 : vector<84x2xf32> to vector<84x2xbf16>
    %cst_136 = arith.constant dense<0.000000e+00> : vector<10x2xf32>
    %151 = tpu.matmul %149, %150, %cst_136 {dimension_numbers = #tpu.dot_dimension_numbers<[1], [0], [0], [1], [0, 0, 1, 1], [], []>} : vector<10x84xbf16>, vector<84x2xbf16>, vector<10x2xf32> -> vector<10x2xf32>
    %c240_137 = arith.constant 240 : index
    %c0_138 = arith.constant 0 : index
    %152 = vector.load %arg2[%c240_137, %c0_138] : memref<256x1xf32, #tpu.memory_space<vmem>>, vector<10x1xf32>
    %153 = vector.broadcast %152 : vector<10x1xf32> to vector<10x2xf32>
    %154 = arith.addf %151, %153 : vector<10x2xf32>
    %c0_139 = arith.constant 0 : index
    %c0_140 = arith.constant 0 : index
    %155 = vector.load %arg3[%c0_139, %c0_140] : memref<10x2xf32, #tpu.memory_space<vmem>>, vector<10x2xf32>
    tpu.vector_store %arg3[%c0_139, %c0_140], %154 {strides = array<i32>} : memref<10x2xf32, #tpu.memory_space<vmem>>, vector<10x2xf32>,
    return
  }
}

</mosaic_0001>

<bundles_post_ra>
// kernel: lenet_forward.1
= control target key start
LH: loop header
LB: loop body
LE: loop exit
PB: predicated region body
PF: predicated region fallthrough
CT: control target
= control target key end

     0   :  { %v3203_v3 = vmov 0   ;;  %vm490_vm0 = vcmask 1044480   ;;  %vm491_vm1 = vcmask 1045504   ;;  %v3204_v29 = vmov 65535   ;;  %s3206_s16 = smov 124   ;;  %s3207_s17 = smov 122   ;;  %s4228_s0 = inlined_call_operand.vmem [shape: bf16[75,2048], index: 0, kind: input, shape index: {}]   ;;  %s4229_s1 = inlined_call_operand.vmem [shape: bf16[272,400], index: 1, kind: input, shape index: {}]   ;;  %s4230_s2 = inlined_call_operand.vmem [shape: f32[256,1], index: 2, kind: input, shape index: {}]   ;;  %s4231_s3 = inlined_call_operand.vmem [shape: f32[10,2], index: 3, kind: output, shape index: {}]  }
   0x1   :  { %v17_v0 = vld [vmem:[%s4228_s0] sm:$0xff]  ;;  %v18_v2 = vld [vmem:[%s4228_s0 + $0x8] sm:$0xff]  ;;  %617 = vmatprep.mubr.bf16.mxu1 %v3203_v3  ;;  %574 = vmatprep.mubr.bf16.mxu0 %v3203_v3  ;;  %v492_v30 = vsel %vm490_vm0, 4294967295, %v3204_v29  ;;  %v19_v46 = vld [vmem:[%s4228_s0 + $0x10] sm:$0xff]  ;;  %vm486_vm2 = vcmask 613376   ;;  %vm951_vm3 = vcmask 130048  }
   0x2   :  { %v25_v1 = vld [vmem:[%s4228_s0 + $0x40] sm:$0xff]  ;;  %v26_v5 = vld [vmem:[%s4228_s0 + $0x48] sm:$0xff]  ;;  %3111 = vset.pattern.permute.xlu0 %v3203_v3  ;;  %3112 = vset.pattern.permute.xlu1 %v3203_v3  ;;  %v3328_v38 = vsel %vm491_vm1, %v492_v30, 0  ;;  %v27_v47 = vld [vmem:[%s4228_s0 + $0x50] sm:$0xff]  ;;  %s3208_s18 = smov 120   ;;  %s3209_s19 = smov 100  }
   0x3   :  { %v2763_v4 = vcombine.high %v17_v0, %v25_v1  ;;  %v2762_v6 = vcombine.low %v17_v0, %v25_v1  ;;  %v33_v7 = vld [vmem:[%s4228_s0 + $0x80] sm:$0xff]  ;;  %v2765_v9 = vcombine.high %v18_v2, %v26_v5  ;;  %v2764_v10 = vcombine.low %v18_v2, %v26_v5  ;;  %v34_v12 = vld [vmem:[%s4228_s0 + $0x88] sm:$0xff]  ;;  %v20_v48 = vld [vmem:[%s4228_s0 + $0x18] sm:$0xff]  ;;  %s3210_s20 = smov 98   ;;  %s3211_s21 = smov 96  }
   0x4   :  { %v41_v8 = vld [vmem:[%s4228_s0 + $0xc0] sm:$0xff]  ;;  %v42_v13 = vld [vmem:[%s4228_s0 + $0xc8] sm:$0xff]  ;;  %v28_v49 = vld [vmem:[%s4228_s0 + $0x58] sm:$0xff]  ;;  %v2767_v52 = vcombine.high %v19_v46, %v27_v47  ;;  %v2766_v59 = vcombine.low %v19_v46, %v27_v47  ;;  %s3212_s22 = smov 94   ;;  %s3213_s23 = smov 92   ;;  %vm1007_vm4 = vcmask 998400  }
   0x5   :  { %v2779_v11 = vcombine.high %v33_v7, %v41_v8  ;;  %v49_v14 = vld [vmem:[%s4228_s0 + $0x100] sm:$0xff]  ;;  %542 = vmatprep.subr.bf16.mxu0 %v2763_v4  ;;  %v2781_v15 = vcombine.high %v34_v12, %v42_v13  ;;  %v50_v17 = vld [vmem:[%s4228_s0 + $0x108] sm:$0xff]  ;;  %585 = vmatprep.subr.bf16.mxu1 %v2765_v9  ;;  %v2778_v19 = vcombine.low %v33_v7, %v41_v8  ;;  %v35_v54 = vld [vmem:[%s4228_s0 + $0x90] sm:$0xff]  ;;  %s3214_s24 = smov 72   ;;  %s3215_s25 = smov 70   ;;  %vm965_vm5 = vcmask 1031168  }
   0x6   :  { %v57_v16 = vld [vmem:[%s4228_s0 + $0x140] sm:$0xff]  ;;  %v58_v18 = vld [vmem:[%s4228_s0 + $0x148] sm:$0xff]  ;;  %543 = vmatpush1.bf16.msra.mxu0 %v2762_v6  ;;  %586 = vmatpush1.bf16.msra.mxu1 %v2764_v10  ;;  %v2780_v21 = vcombine.low %v34_v12, %v42_v13  ;;  %v2769_v53 = vcombine.high %v20_v48, %v28_v49  ;;  %v43_v55 = vld [vmem:[%s4228_s0 + $0xd0] sm:$0xff]  ;;  %v2768_v60 = vcombine.low %v20_v48, %v28_v49  ;;  %s3216_s26 = smov 68   ;;  %s3217_s27 = smov 66   ;;  %vm986_vm6 = vcmask 1014784  }
   0x7   :  { %v65_v20 = vld [vmem:[%s4228_s0 + $0x180] sm:$0xff]  ;;  %544 = vmatprep.subr.bf16.mxu0 %v2779_v11  ;;  %v2795_v22 = vcombine.high %v49_v14, %v57_v16  ;;  %v66_v24 = vld [vmem:[%s4228_s0 + $0x188] sm:$0xff]  ;;  %587 = vmatprep.subr.bf16.mxu1 %v2781_v15  ;;  %v2797_v26 = vcombine.high %v50_v17, %v58_v18  ;;  %v2794_v33 = vcombine.low %v49_v14, %v57_v16  ;;  %v36_v57 = vld [vmem:[%s4228_s0 + $0x98] sm:$0xff]  ;;  %s3218_s28 = smov 64   ;;  %s3219_s29 = smov 44   ;;  %vm1049_vm7 = vcmask 818176  }
   0x8   :  { %v73_v23 = vld [vmem:[%s4228_s0 + $0x1c0] sm:$0xff]  ;;  %v74_v25 = vld [vmem:[%s4228_s0 + $0x1c8] sm:$0xff]  ;;  %v2796_v34 = vcombine.low %v50_v17, %v58_v18  ;;  %v44_v58 = vld [vmem:[%s4228_s0 + $0xd8] sm:$0xff]  ;;  %v2783_v61 = vcombine.high %v35_v54, %v43_v55  ;;  %v2782_v4 = vcombine.low %v35_v54, %v43_v55  ;;  %s3220_s5 = smov 42   ;;  %s3221_s6 = smov 40   ;;  %vm1028_vm8 = vcmask 982016  }
   0x9   :  { %v81_v27 = vld [vmem:[%s4228_s0 + $0x200] sm:$0xff]  ;;  %v82_v31 = vld [vmem:[%s4228_s0 + $0x208] sm:$0xff]  ;;  %v2811_v35 = vcombine.high %v65_v20, %v73_v23  ;;  %v2813_v37 = vcombine.high %v66_v24, %v74_v25  ;;  %v2810_v40 = vcombine.low %v65_v20, %v73_v23  ;;  %v2812_v42 = vcombine.low %v66_v24, %v74_v25  ;;  %v51_v63 = vld [vmem:[%s4228_s0 + $0x110] sm:$0xff]  ;;  %s3222_s7 = smov 38   ;;  %s3223_s8 = smov 36  }
   0xa   :  { %v89_v28 = vld [vmem:[%s4228_s0 + $0x240] sm:$0x33]  ;;  %v90_v32 = vld [vmem:[%s4228_s0 + $0x248] sm:$0x33]  ;;  %545 = vmatpush1.bf16.msra.mxu0 %v2778_v19  ;;  %588 = vmatpush1.bf16.msra.mxu1 %v2780_v21  ;;  %v2785_v62 = vcombine.high %v36_v57, %v44_v58  ;;  %v59_v0 = vld [vmem:[%s4228_s0 + $0x150] sm:$0xff]  ;;  %v2784_v7 = vcombine.low %v36_v57, %v44_v58  ;;  %s3224_s9 = smov 16  }
   0xb   :  { %546 = vmatprep.subr.bf16.mxu0 %v2795_v22  ;;  %v2827_v36 = vcombine.high %v81_v27, %v89_v28  ;;  %589 = vmatprep.subr.bf16.mxu1 %v2797_v26  ;;  %v2829_v39 = vcombine.high %v82_v31, %v90_v32  ;;  %v2826_v41 = vcombine.low %v81_v27, %v89_v28  ;;  %v3355_v56 = vld [vmem:[%s4229_s1] ss:$16 sps:$4 sm:$0xff]   ;;  %v52_v1 = vld [vmem:[%s4228_s0 + $0x118] sm:$0xff]  ;;  %v911_v24 = vld [vmem:[%s4230_s2 + $0x8] sm:$0xff]  ;;  %s3225_s10 = smov 14   ;;  %s3226_s11 = smov 12  }
   0xc   :  { %v2828_v44 = vcombine.low %v82_v31, %v90_v32  ;;  %v60_v2 = vld [vmem:[%s4228_s0 + $0x158] sm:$0xff]  ;;  %v67_v5 = vld [vmem:[%s4228_s0 + $0x190] sm:$0xff]  ;;  %v2799_v8 = vcombine.high %v51_v63, %v59_v0  ;;  %v910_v18 = vld [vmem:[%s4230_s2] sm:$0xff]  ;;  %v2798_v19 = vcombine.low %v51_v63, %v59_v0  ;;  %s3227_s12 = smov 10   ;;  %s3228_s13 = smov 8   ;;  %vm1091_vm9 = vcmask 785408  }
   0xd   :  { %v498_v43 = vand.u32 %v2827_v36, %v3328_v38  ;;  %v504_v45 = vand.u32 %v2829_v39, %v3328_v38  ;;  %v495_v50 = vand.u32 %v2826_v41, %v3328_v38  ;;  %v75_v6 = vld [vmem:[%s4228_s0 + $0x1d0] sm:$0xff]  ;;  %v68_v9 = vld [vmem:[%s4228_s0 + $0x198] sm:$0xff]  ;;  %v2801_v12 = vcombine.high %v52_v1, %v60_v2  ;;  %914 = vperm.xlu0 %3111, %v910_v18   ;;  %v21_v30 = vld [vmem:[%s4228_s0 + $0x20] sm:$0xff]  ;;  %s3231_s30 = smov 56   ;;  %s3232_s4 = smov 80  }
   0xe   :  { %547 = vmatpush1.bf16.msra.mxu0 %v2794_v33  ;;  %590 = vmatpush1.bf16.msra.mxu1 %v2796_v34  ;;  %v501_v51 = vand.u32 %v2828_v44, %v3328_v38  ;;  %v76_v10 = vld [vmem:[%s4228_s0 + $0x1d8] sm:$0xff]  ;;  %v83_v11 = vld [vmem:[%s4228_s0 + $0x210] sm:$0xff]  ;;  %v2800_v21 = vcombine.low %v52_v1, %v60_v2  ;;  %v2815_v22 = vcombine.high %v67_v5, %v75_v6  ;;  %v29_v31 = vld [vmem:[%s4228_s0 + $0x60] sm:$0xff]  ;;  %vm1070_vm10 = vcmask 801792  }
   0xf   :  { %548 = vmatprep.subr.bf16.mxu0 %v2811_v35  ;;  %591 = vmatprep.subr.bf16.mxu1 %v2813_v37  ;;  %v91_v13 = vld [vmem:[%s4228_s0 + $0x250] sm:$0x33]  ;;  %v84_v14 = vld [vmem:[%s4228_s0 + $0x218] sm:$0xff]  ;;  %v2817_v25 = vcombine.high %v68_v9, %v76_v10  ;;  %v2814_v28 = vcombine.low %v67_v5, %v75_v6  ;;  %v2816_v32 = vcombine.low %v68_v9, %v76_v10  ;;  %v22_v35 = vld [vmem:[%s4228_s0 + $0x28] sm:$0xff]  ;;  %vm1133_vm11 = vcmask 752640  }
  0x10   :  { %v92_v15 = vld [vmem:[%s4228_s0 + $0x258] sm:$0x33]  ;;  %v2831_v23 = vcombine.high %v83_v11, %v91_v13  ;;  %v2830_v29 = vcombine.low %v83_v11, %v91_v13  ;;  %v30_v36 = vld [vmem:[%s4228_s0 + $0x68] sm:$0xff]  ;;  %v45_v41 = vld [vmem:[%s4228_s0 + $0xe0] sm:$0xff]  ;;  %v2770_v47 = vcombine.low %v21_v30, %v29_v31  ;;  %vm1112_vm12 = vcmask 769024  }
  0x11   :  { %v3408_v16 = vld [vmem:[%s4228_s0 + $0x238] sm:$0xff]  ;;  %v2833_v26 = vcombine.high %v84_v14, %v92_v15  ;;  %v2832_v34 = vcombine.low %v84_v14, %v92_v15  ;;  %919 = vperm.xlu0 %3111, %v911_v24   ;;  %v38_v44 = vld [vmem:[%s4228_s0 + $0xa8] sm:$0xff]  ;;  %v2773_v46 = vcombine.high %v22_v35, %v30_v36  ;;  %v53_v48 = vld [vmem:[%s4228_s0 + $0x120] sm:$0xff]  ;;  %vm1175_vm13 = vcmask 572416  }
  0x12   :  { %549 = vmatpush1.bf16.msra.mxu0 %v2810_v40  ;;  %592 = vmatpush1.bf16.msra.mxu1 %v2812_v42  ;;  %v3413_v17 = vld [vmem:[%s4228_s0 + $0x278] sm:$0x33]  ;;  %v510_v33 = vand.u32 %v2831_v23, %v3328_v38  ;;  %v507_v39 = vand.u32 %v2830_v29, %v3328_v38  ;;  %v37_v40 = vld [vmem:[%s4228_s0 + $0xa0] sm:$0xff]  ;;  %v62_v54 = vld [vmem:[%s4228_s0 + $0x168] sm:$0xff]  ;;  %vm1154_vm14 = vcmask 588800   ;;  %vm1217_vm15 = vcmask 539648  }
  0x13   :  { %550 = vmatprep.subr.bf16.mxu0 %v498_v43  ;;  %593 = vmatprep.subr.bf16.mxu1 %v504_v45  ;;  %v2840_v20 = vcombine.low %v3408_v16, %v3413_v17  ;;  %v516_v37 = vand.u32 %v2833_v26, %v3328_v38  ;;  %v513_v42 = vand.u32 %v2832_v34, %v3328_v38  ;;  %v46_v45 = vld [vmem:[%s4228_s0 + $0xe8] sm:$0xff]  ;;  %v61_v49 = vld [vmem:[%s4228_s0 + $0x160] sm:$0xff]  ;;  %v47_v29 = vld [vmem:[%s4228_s0 + $0xf0] sm:$0xff]  ;;  %vm1196_vm0 = vcmask 556032  }
  0x14   :  { %v2771_v43 = vcombine.high %v21_v30, %v29_v31  ;;  %v2786_v55 = vcombine.low %v37_v40, %v45_v41  ;;  %v2788_v57 = vcombine.low %v38_v44, %v46_v45  ;;  %v2803_v58 = vcombine.high %v53_v48, %v61_v49  ;;  %v85_v63 = vld [vmem:[%s4228_s0 + $0x220] sm:$0xff]  ;;  %v78_v1 = vld [vmem:[%s4228_s0 + $0x1e8] sm:$0xff]  ;;  %v40_v30 = vld [vmem:[%s4228_s0 + $0xb8] sm:$0xff] }
  0x15   :  { %v3424_v27 = vand.u32 %v2840_v20, %v3328_v38  ;;  %v93_v0 = vld [vmem:[%s4228_s0 + $0x260] sm:$0x33]  ;;  %v86_v2 = vld [vmem:[%s4228_s0 + $0x228] sm:$0xff]  ;;  %v2802_v5 = vcombine.low %v53_v48, %v61_v49  ;;  %v31_v20 = vld [vmem:[%s4228_s0 + $0x70] sm:$0xff]  ;;  %vm1259_vm1 = vcmask 359424  }
  0x16   :  { %551 = vmatpush1.bf16.msra.mxu0 %v495_v50  ;;  %594 = vmatpush1.bf16.msra.mxu1 %v501_v51  ;;  %v2772_v50 = vcombine.low %v22_v35, %v30_v36  ;;  %v2787_v51 = vcombine.high %v37_v40, %v45_v41  ;;  %v48_v31 = vld [vmem:[%s4228_s0 + $0xf8] sm:$0xff]  ;;  %v55_v36 = vld [vmem:[%s4228_s0 + $0x130] sm:$0xff] }
  0x17   :  { %628 = vmatprep.subr.bf16.mxu0 %v2767_v52  ;;  %671 = vmatprep.subr.bf16.mxu1 %v2769_v53  ;;  %v2789_v52 = vcombine.high %v38_v44, %v46_v45  ;;  %v54_v53 = vld [vmem:[%s4228_s0 + $0x128] sm:$0xff]  ;;  %v2793_v35 = vcombine.high %v40_v30, %v48_v31  ;;  %v64_v40 = vld [vmem:[%s4228_s0 + $0x178] sm:$0xff]  ;;  %v71_v44 = vld [vmem:[%s4228_s0 + $0x1b0] sm:$0xff] }
  0x18   :  { %v2804_v6 = vcombine.low %v54_v53, %v62_v54  ;;  %v95_v48 = vld [vmem:[%s4228_s0 + $0x270] sm:$0x33]  ;;  %v72_v49 = vld [vmem:[%s4228_s0 + $0x1b8] sm:$0xff] }
  0x19   :  { %2842 = vmatmul.mubr.msk.bf16.vlgmr.msra.gmra.mrb[0].mxu0 %vm486_vm2, %v3355_v56  ;;  %2843 = vmatmul.mubr.msk.bf16.vlgmr.msra.gmra.mrb[0].mxu1 %vm486_vm2, %v3355_v56 }
  0x1a   :  { %629 = vmatpush1.bf16.msra.mxu0 %v2766_v59  ;;  %672 = vmatpush1.bf16.msra.mxu1 %v2768_v60  ;;  %v69_v59 = vld [vmem:[%s4228_s0 + $0x1a0] sm:$0xff] }
  0x1b   :  { %630 = vmatprep.subr.bf16.mxu0 %v2783_v61  ;;  %673 = vmatprep.subr.bf16.mxu1 %v2785_v62  ;;  %v77_v60 = vld [vmem:[%s4228_s0 + $0x1e0] sm:$0xff]  ;;  %v2805_v61 = vcombine.high %v54_v53, %v62_v54  ;;  %v70_v62 = vld [vmem:[%s4228_s0 + $0x1a8] sm:$0xff] }
  0x1c   :  { %660 = vmatprep.mubr.bf16.mxu0 %v3203_v3  ;;  %703 = vmatprep.mubr.bf16.mxu1 %v3203_v3  ;;  %v2821_v9 = vcombine.high %v70_v62, %v78_v1  ;;  %v2818_v11 = vcombine.low %v69_v59, %v77_v60  ;;  %v2820_v13 = vcombine.low %v70_v62, %v78_v1 }
  0x1e   :  { %631 = vmatpush1.bf16.msra.mxu0 %v2782_v4  ;;  %674 = vmatpush1.bf16.msra.mxu1 %v2784_v7  ;;  %v94_v4 = vld [vmem:[%s4228_s0 + $0x268] sm:$0x33]  ;;  %v2819_v7 = vcombine.high %v69_v59, %v77_v60 }
  0x1f   :  { %632 = vmatprep.subr.bf16.mxu0 %v2799_v8  ;;  %675 = vmatprep.subr.bf16.mxu1 %v2801_v12  ;;  %v2835_v8 = vcombine.high %v85_v63, %v93_v0  ;;  %v2837_v10 = vcombine.high %v86_v2, %v94_v4  ;;  %v2834_v12 = vcombine.low %v85_v63, %v93_v0 }
  0x20   :  { %v2836_v15 = vcombine.low %v86_v2, %v94_v4 }
  0x21   :  { %v522_v14 = vand.u32 %v2835_v8, %v3328_v38  ;;  %v528_v18 = vand.u32 %v2837_v10, %v3328_v38  ;;  %v519_v23 = vand.u32 %v2834_v12, %v3328_v38 }
  0x22   :  { %633 = vmatpush1.bf16.msra.mxu0 %v2798_v19  ;;  %676 = vmatpush1.bf16.msra.mxu1 %v2800_v21  ;;  %v23_v19 = vld [vmem:[%s4228_s0 + $0x30] sm:$0xff]  ;;  %v24_v21 = vld [vmem:[%s4228_s0 + $0x38] sm:$0xff]  ;;  %v525_v24 = vand.u32 %v2836_v15, %v3328_v38 }
  0x23   :  { %634 = vmatprep.subr.bf16.mxu0 %v2815_v22  ;;  %677 = vmatprep.subr.bf16.mxu1 %v2817_v25  ;;  %v32_v22 = vld [vmem:[%s4228_s0 + $0x78] sm:$0xff]  ;;  %v2775_v25 = vcombine.high %v23_v19, %v31_v20 }
  0x24   :  { %v2777_v26 = vcombine.high %v24_v21, %v32_v22 }
  0x26   :  { %635 = vmatpush1.bf16.msra.mxu0 %v2814_v28  ;;  %678 = vmatpush1.bf16.msra.mxu1 %v2816_v32  ;;  %v39_v28 = vld [vmem:[%s4228_s0 + $0xb0] sm:$0xff]  ;;  %v2774_v32 = vcombine.low %v23_v19, %v31_v20 }
  0x27   :  { %636 = vmatprep.subr.bf16.mxu0 %v510_v33  ;;  %679 = vmatprep.subr.bf16.mxu1 %v516_v37  ;;  %v2776_v33 = vcombine.low %v24_v21, %v32_v22  ;;  %v2791_v34 = vcombine.high %v39_v28, %v47_v29  ;;  %v63_v37 = vld [vmem:[%s4228_s0 + $0x170] sm:$0xff]  ;;  %v2790_v41 = vcombine.low %v39_v28, %v47_v29 }
  0x2a   :  { %637 = vmatpush1.bf16.msra.mxu0 %v507_v39  ;;  %680 = vmatpush1.bf16.msra.mxu1 %v513_v42  ;;  %v56_v39 = vld [vmem:[%s4228_s0 + $0x138] sm:$0xff]  ;;  %v2792_v42 = vcombine.low %v40_v30, %v48_v31 }
  0x2b   :  { %714 = vmatprep.subr.bf16.mxu0 %v2771_v43  ;;  %757 = vmatprep.subr.bf16.mxu1 %v2773_v46  ;;  %v2807_v43 = vcombine.high %v55_v36, %v63_v37  ;;  %v2809_v45 = vcombine.high %v56_v39, %v64_v40  ;;  %v79_v46 = vld [vmem:[%s4228_s0 + $0x1f0] sm:$0xff] }
  0x2c   :  { %v2823_v53 = vcombine.high %v71_v44, %v79_v46 }
  0x2d   :  { %2844 = vmatmul.mubr.msk.bf16.vlgmr.msra.gmra.mrb[4].mxu0 %vm486_vm2, %v3355_v56  ;;  %2845 = vmatmul.mubr.msk.bf16.vlgmr.msra.gmra.mrb[4].mxu1 %vm486_vm2, %v3355_v56 }
  0x2e   :  { %715 = vmatpush1.bf16.msra.mxu0 %v2770_v47  ;;  %758 = vmatpush1.bf16.msra.mxu1 %v2772_v50  ;;  %v87_v47 = vld [vmem:[%s4228_s0 + $0x230] sm:$0xff]  ;;  %v80_v50 = vld [vmem:[%s4228_s0 + $0x1f8] sm:$0xff]  ;;  %s3205_s0 = smov 126  }
  0x2f   :  { %716 = vmatprep.subr.bf16.mxu0 %v2787_v51  ;;  %759 = vmatprep.subr.bf16.mxu1 %v2789_v52  ;;  %v2806_v51 = vcombine.low %v55_v36, %v63_v37  ;;  %v2808_v52 = vcombine.low %v56_v39, %v64_v40  ;;  %v2839_v54 = vcombine.high %v87_v47, %v95_v48 }
  0x30   :  { %789 = vmatprep.mubr.bf16.mxu1 %v3203_v3  ;;  %746 = vmatprep.mubr.bf16.mxu0 %v3203_v3  ;;  %v2838_v59 = vcombine.low %v87_v47, %v95_v48  ;;  %v2824_v60 = vcombine.low %v72_v49, %v80_v50 }
  0x32   :  { %717 = vmatpush1.bf16.msra.mxu0 %v2786_v55  ;;  %760 = vmatpush1.bf16.msra.mxu1 %v2788_v57  ;;  %v2825_v55 = vcombine.high %v72_v49, %v80_v50  ;;  %v2841_v57 = vcombine.high %v3408_v16, %v3413_v17  ;;  %v531_v63 = vand.u32 %v2838_v59, %v3328_v38 }
  0x33   :  { %718 = vmatprep.subr.bf16.mxu0 %v2803_v58  ;;  %761 = vmatprep.subr.bf16.mxu1 %v2805_v61  ;;  %v2822_v58 = vcombine.low %v71_v44, %v79_v46  ;;  %v534_v61 = vand.u32 %v2839_v54, %v3328_v38 }
  0x34   :  { %v540_v62 = vand.u32 %v2841_v57, %v3328_v38 }
  0x36   :  { %719 = vmatpush1.bf16.msra.mxu0 %v2802_v5  ;;  %762 = vmatpush1.bf16.msra.mxu1 %v2804_v6 }
  0x37   :  { %720 = vmatprep.subr.bf16.mxu0 %v2819_v7  ;;  %763 = vmatprep.subr.bf16.mxu1 %v2821_v9 }
  0x3a   :  { %721 = vmatpush1.bf16.msra.mxu0 %v2818_v11  ;;  %764 = vmatpush1.bf16.msra.mxu1 %v2820_v13 }
  0x3b   :  { %722 = vmatprep.subr.bf16.mxu0 %v522_v14  ;;  %765 = vmatprep.subr.bf16.mxu1 %v528_v18 }
  0x3e   :  { %723 = vmatpush1.bf16.msra.mxu0 %v519_v23  ;;  %766 = vmatpush1.bf16.msra.mxu1 %v525_v24 }
  0x3f   :  { %800 = vmatprep.subr.bf16.mxu0 %v2775_v25  ;;  %843 = vmatprep.subr.bf16.mxu1 %v2777_v26 }
  0x41   :  { %2846 = vmatmul.mubr.msk.bf16.vlgmr.msra.gmra.mrb[8].mxu0 %vm486_vm2, %v3355_v56  ;;  %2847 = vmatmul.mubr.msk.bf16.vlgmr.msra.gmra.mrb[8].mxu1 %vm486_vm2, %v3355_v56 }
  0x42   :  { %801 = vmatpush1.bf16.msra.mxu0 %v2774_v32  ;;  %844 = vmatpush1.bf16.msra.mxu1 %v2776_v33 }
  0x43   :  { %802 = vmatprep.subr.bf16.mxu0 %v2791_v34  ;;  %845 = vmatprep.subr.bf16.mxu1 %v2793_v35 }
  0x44   :  { %832 = vmatprep.mubr.bf16.mxu0 %v3203_v3  ;;  %875 = vmatprep.mubr.bf16.mxu1 %v3203_v3 }
  0x46   :  { %803 = vmatpush1.bf16.msra.mxu0 %v2790_v41  ;;  %846 = vmatpush1.bf16.msra.mxu1 %v2792_v42 }
  0x47   :  { %804 = vmatprep.subr.bf16.mxu0 %v2807_v43  ;;  %847 = vmatprep.subr.bf16.mxu1 %v2809_v45 }
  0x4a   :  { %805 = vmatpush1.bf16.msra.mxu0 %v2806_v51  ;;  %848 = vmatpush1.bf16.msra.mxu1 %v2808_v52 }
  0x4b   :  { %806 = vmatprep.subr.bf16.mxu0 %v2823_v53  ;;  %849 = vmatprep.subr.bf16.mxu1 %v2825_v55 }
  0x4e   :  { %807 = vmatpush1.bf16.msra.mxu0 %v2822_v58  ;;  %850 = vmatpush1.bf16.msra.mxu1 %v2824_v60 }
  0x4f   :  { %808 = vmatprep.subr.bf16.mxu0 %v534_v61  ;;  %851 = vmatprep.subr.bf16.mxu1 %v540_v62 }
  0x52   :  { %809 = vmatpush1.bf16.msra.mxu0 %v531_v63  ;;  %852 = vmatpush1.bf16.msra.mxu1 %v3424_v27 }
  0x55   :  { %2848 = vmatmul.mubr.msk.bf16.vlgmr.msra.gmra.mrb[12].mxu0 %vm486_vm2, %v3355_v56  ;;  %2849 = vmatmul.mubr.msk.bf16.vlgmr.msra.gmra.mrb[12].mxu1 %vm486_vm2, %v3355_v56  ;;  %vm1238_vm2 = vcmask 523264  }
  0x8c   :  { %v915_v31 = vpop.permute.xlu0 %914 }
  0x90   :  { %v920_v58 = vpop.permute.xlu0 %919 }
  0xec   :  { %v576_v16 = vpop.f32.mrb[0].mxu0  ;;  %v619_v17 = vpop.f32.mrb[0].mxu1 }
  0xed   :  { %v578_v0 = vpop.f32.mrb[1].mxu0  ;;  %v621_v1 = vpop.f32.mrb[1].mxu1 }
  0xee   :  { %v580_v2 = vpop.f32.mrb[2].mxu0  ;;  %v623_v4 = vpop.f32.mrb[2].mxu1 }
  0xef   :  { %v582_v5 = vpop.f32.mrb[3].mxu0  ;;  %v625_v38 = vpop.f32.mrb[3].mxu1 }
 0x100   :  { %v662_v6 = vpop.f32.mrb[4].mxu0  ;;  %v705_v8 = vpop.f32.mrb[4].mxu1 }
 0x101   :  { %v886_v7 = vmax.f32 %v576_v16, %v662_v6  ;;  %v664_v9 = vpop.f32.mrb[5].mxu0  ;;  %v888_v10 = vmax.f32 %v619_v17, %v705_v8  ;;  %v707_v11 = vpop.f32.mrb[5].mxu1 }
 0x102   :  { %v887_v27 = vmax.f32 %v578_v0, %v664_v9  ;;  %v666_v12 = vpop.f32.mrb[6].mxu0  ;;  %v889_v13 = vmax.f32 %v621_v1, %v707_v11  ;;  %v709_v15 = vpop.f32.mrb[6].mxu1 }
 0x103   :  { %v890_v14 = vmax.f32 %v580_v2, %v666_v12  ;;  %v668_v56 = vpop.f32.mrb[7].mxu0  ;;  %v892_v18 = vmax.f32 %v623_v4, %v709_v15  ;;  %v711_v20 = vpop.f32.mrb[7].mxu1  ;;  %v3146_v12 = vld [vmem:[%s4229_s1 + $0x24] ss:$16 sps:$4 sm:$0xff]  }
 0x104   :  { %v891_v19 = vmax.f32 %v582_v5, %v668_v56  ;;  %v893_v21 = vmax.f32 %v625_v38, %v711_v20  ;;  %1708 = vmatprep.mubr.bf16.mxu1 %v3146_v12  ;;  %1622 = vmatprep.mubr.bf16.mxu0 %v3146_v12 }
 0x114   :  { %v748_v22 = vpop.f32.mrb[8].mxu0  ;;  %v791_v23 = vpop.f32.mrb[8].mxu1 }
 0x115   :  { %v750_v24 = vpop.f32.mrb[9].mxu0  ;;  %v793_v25 = vpop.f32.mrb[9].mxu1 }
 0x116   :  { %v752_v26 = vpop.f32.mrb[10].mxu0  ;;  %v795_v28 = vpop.f32.mrb[10].mxu1 }
 0x117   :  { %v754_v29 = vpop.f32.mrb[11].mxu0  ;;  %v797_v30 = vpop.f32.mrb[11].mxu1 }
 0x128   :  { %v834_v32 = vpop.f32.mrb[12].mxu0  ;;  %v877_v34 = vpop.f32.mrb[12].mxu1 }
 0x129   :  { %v894_v33 = vmax.f32 %v748_v22, %v834_v32  ;;  %v836_v35 = vpop.f32.mrb[13].mxu0  ;;  %v896_v36 = vmax.f32 %v791_v23, %v877_v34  ;;  %v879_v39 = vpop.f32.mrb[13].mxu1 }
 0x12a   :  { %v895_v37 = vmax.f32 %v750_v24, %v836_v35  ;;  %v838_v40 = vpop.f32.mrb[14].mxu0  ;;  %v897_v42 = vmax.f32 %v793_v25, %v879_v39  ;;  %v881_v44 = vpop.f32.mrb[14].mxu1 }
 0x12b   :  { %v902_v41 = vmax.f32 %v886_v7, %v894_v33  ;;  %v898_v43 = vmax.f32 %v752_v26, %v838_v40  ;;  %v840_v45 = vpop.f32.mrb[15].mxu0  ;;  %v904_v46 = vmax.f32 %v888_v10, %v896_v36  ;;  %v900_v48 = vmax.f32 %v795_v28, %v881_v44  ;;  %v883_v50 = vpop.f32.mrb[15].mxu1  ;;  %v1557_v40 = vld [vmem:[%s4230_s2 + $0x18] sm:$0xff] }
 0x12c   :  { %v903_v47 = vmax.f32 %v887_v27, %v895_v37  ;;  %v899_v49 = vmax.f32 %v754_v29, %v840_v45  ;;  %v905_v52 = vmax.f32 %v889_v13, %v897_v42  ;;  %v901_v54 = vmax.f32 %v797_v30, %v883_v50 }
 0x12d   :  { %v922_v51 = vadd.f32 %v915_v31, %v902_v41  ;;  %v906_v53 = vmax.f32 %v890_v14, %v898_v43  ;;  %v924_v55 = vadd.f32 %v915_v31, %v904_v46  ;;  %v908_v59 = vmax.f32 %v892_v18, %v900_v48 }
 0x12e   :  { %v923_v57 = vadd.f32 %v915_v31, %v903_v47  ;;  %v907_v60 = vmax.f32 %v891_v19, %v899_v49  ;;  %v925_v61 = vadd.f32 %v915_v31, %v905_v52  ;;  %v909_v63 = vmax.f32 %v893_v21, %v901_v54  ;;  %v1556_v31 = vld [vmem:[%s4230_s2 + $0x10] sm:$0xff] }
 0x12f   :  { %v926_v62 = vadd.f32 %v920_v58, %v906_v53  ;;  %v928_v16 = vadd.f32 %v920_v58, %v908_v59  ;;  %v930_v0 = vmax.f32 %v922_v51, 0.0  ;;  %v932_v4 = vmax.f32 %v924_v55, 0.0 }
 0x130   :  { %v927_v17 = vadd.f32 %v920_v58, %v907_v60  ;;  %v929_v2 = vadd.f32 %v920_v58, %v909_v63  ;;  %v931_v5 = vmax.f32 %v923_v57, 0.0  ;;  %v933_v7 = vmax.f32 %v925_v61, 0.0 }
 0x131   :  { %v934_v1 = vmax.f32 %v926_v62, 0.0  ;;  %v936_v38 = vmax.f32 %v928_v16, 0.0 }
 0x132   :  { %v935_v6 = vmax.f32 %v927_v17, 0.0  ;;  %v937_v9 = vmax.f32 %v929_v2, 0.0 }
 0x133   :  { %v3570_v8 = vpack.c.bf16 %v934_v1, %v930_v0  ;;  %v3572_v10 = vpack.c.bf16 %v936_v38, %v932_v4 }
 0x134   :  { %v3574_v27 = vpack.c.bf16 %v935_v6, %v931_v5  ;;  %v3576_v11 = vpack.c.bf16 %v937_v9, %v933_v7 }
 0x135   :  { %959 = vrot.lane.b32.xlu0 %v3570_v8, %s3205_s0  ;;  %963 = vrot.lane.b32.xlu1 %v3572_v10, %s3205_s0  ;;  %952 = vst.msk [vmem:[#allocation3 + $0x10] sm:$0xff] %vm951_vm3, %v3572_v10 }
 0x136   :  { %1590 = vmatprep.subr.bf16.mxu0 %v3574_v27 }
 0x137   :  { %1591 = vmatpush1.bf16.msra.mxu0 %v3570_v8 }
 0x139   :  { %984 = vrot.lane.b32.xlu0 %v3572_v10, %s3206_s16  ;;  %980 = vrot.lane.b32.xlu1 %v3570_v8, %s3206_s16 }
 0x13c   :  { %v1483_v37 = vld [vmem:[#allocation3 + $0x10] sm:$0xff] }
 0x13d   :  { %1001 = vrot.lane.b32.xlu0 %v3570_v8, %s3207_s17  ;;  %1005 = vrot.lane.b32.xlu1 %v3572_v10, %s3207_s17 }
 0x141   :  { %1026 = vrot.lane.b32.xlu0 %v3572_v10, %s3208_s18  ;;  %1022 = vrot.lane.b32.xlu1 %v3570_v8, %s3208_s18 }
 0x145   :  { %1043 = vrot.lane.b32.xlu0 %v3570_v8, %s3209_s19  ;;  %1047 = vrot.lane.b32.xlu1 %v3572_v10, %s3209_s19 }
 0x149   :  { %1068 = vrot.lane.b32.xlu0 %v3572_v10, %s3210_s20  ;;  %1064 = vrot.lane.b32.xlu1 %v3570_v8, %s3210_s20 }
 0x14d   :  { %1085 = vrot.lane.b32.xlu0 %v3570_v8, %s3211_s21  ;;  %1089 = vrot.lane.b32.xlu1 %v3572_v10, %s3211_s21 }
 0x151   :  { %1110 = vrot.lane.b32.xlu0 %v3572_v10, %s3212_s22  ;;  %1106 = vrot.lane.b32.xlu1 %v3570_v8, %s3212_s22 }
 0x155   :  { %1127 = vrot.lane.b32.xlu0 %v3570_v8, %s3213_s23  ;;  %1131 = vrot.lane.b32.xlu1 %v3572_v10, %s3213_s23 }
 0x159   :  { %1152 = vrot.lane.b32.xlu0 %v3572_v10, %s3214_s24  ;;  %1148 = vrot.lane.b32.xlu1 %v3570_v8, %s3214_s24 }
 0x15d   :  { %1169 = vrot.lane.b32.xlu0 %v3570_v8, %s3215_s25  ;;  %1173 = vrot.lane.b32.xlu1 %v3572_v10, %s3215_s25 }
 0x161   :  { %1194 = vrot.lane.b32.xlu0 %v3572_v10, %s3216_s26  ;;  %1190 = vrot.lane.b32.xlu1 %v3570_v8, %s3216_s26 }
 0x165   :  { %1211 = vrot.lane.b32.xlu0 %v3570_v8, %s3217_s27  ;;  %1215 = vrot.lane.b32.xlu1 %v3572_v10, %s3217_s27 }
 0x169   :  { %1236 = vrot.lane.b32.xlu0 %v3572_v10, %s3218_s28  ;;  %1232 = vrot.lane.b32.xlu1 %v3570_v8, %s3218_s28 }
 0x16d   :  { %1003 = vrot.lane.b32.xlu0 %v3574_v27, %s3207_s17  ;;  %961 = vrot.lane.b32.xlu1 %v3574_v27, %s3205_s0 }
 0x171   :  { %1253 = vrot.lane.b32.xlu0 %v3570_v8, %s3219_s29  ;;  %982 = vrot.lane.b32.xlu1 %v3574_v27, %s3206_s16 }
 0x175   :  { %1045 = vrot.lane.b32.xlu0 %v3574_v27, %s3209_s19  ;;  %1257 = vrot.lane.b32.xlu1 %v3572_v10, %s3219_s29 }
 0x179   :  { %1278 = vrot.lane.b32.xlu0 %v3572_v10, %s3220_s5  ;;  %1024 = vrot.lane.b32.xlu1 %v3574_v27, %s3208_s18 }
 0x17d   :  { %1087 = vrot.lane.b32.xlu0 %v3574_v27, %s3211_s21  ;;  %1274 = vrot.lane.b32.xlu1 %v3570_v8, %s3220_s5 }
 0x181   :  { %1295 = vrot.lane.b32.xlu0 %v3570_v8, %s3221_s6  ;;  %1066 = vrot.lane.b32.xlu1 %v3574_v27, %s3210_s20 }
 0x185   :  { %1129 = vrot.lane.b32.xlu0 %v3574_v27, %s3213_s23  ;;  %1299 = vrot.lane.b32.xlu1 %v3572_v10, %s3221_s6 }
 0x189   :  { %1320 = vrot.lane.b32.xlu0 %v3572_v10, %s3222_s7  ;;  %1108 = vrot.lane.b32.xlu1 %v3574_v27, %s3212_s22 }
 0x18d   :  { %1171 = vrot.lane.b32.xlu0 %v3574_v27, %s3215_s25  ;;  %1316 = vrot.lane.b32.xlu1 %v3570_v8, %s3222_s7 }
 0x191   :  { %1337 = vrot.lane.b32.xlu0 %v3570_v8, %s3223_s8  ;;  %1150 = vrot.lane.b32.xlu1 %v3574_v27, %s3214_s24 }
 0x195   :  { %1213 = vrot.lane.b32.xlu0 %v3574_v27, %s3217_s27  ;;  %1341 = vrot.lane.b32.xlu1 %v3572_v10, %s3223_s8 }
 0x199   :  { %1362 = vrot.lane.b32.xlu0 %v3572_v10, %s3224_s9  ;;  %1192 = vrot.lane.b32.xlu1 %v3574_v27, %s3216_s26 }
 0x19d   :  { %1255 = vrot.lane.b32.xlu0 %v3574_v27, %s3219_s29  ;;  %1358 = vrot.lane.b32.xlu1 %v3570_v8, %s3224_s9 }
 0x1a1   :  { %1381 = vrot.lane.b32.xlu0 %v3570_v8, %s3225_s10  ;;  %1234 = vrot.lane.b32.xlu1 %v3574_v27, %s3218_s28 }
 0x1a5   :  { %1297 = vrot.lane.b32.xlu0 %v3574_v27, %s3221_s6  ;;  %1385 = vrot.lane.b32.xlu1 %v3572_v10, %s3225_s10  ;;  %s3234_s6 = smov 116  }
 0x1a7   :  { %v3696_v13 = vpop.permute.xlu0 %959  ;;  %v3698_v14 = vpop.permute.xlu1 %963 }
 0x1a8   :  { %973 = vst.msk [vmem:[#allocation3 + $0x28] sm:$0xff] %vm951_vm3, %v3698_v14 }
 0x1a9   :  { %1407 = vrot.lane.b32.xlu0 %v3570_v8, %s3226_s11  ;;  %1276 = vrot.lane.b32.xlu1 %v3574_v27, %s3220_s5  ;;  %s3233_s5 = smov 76  }
 0x1ab   :  { %v3706_v15 = vpop.permute.xlu0 %984  ;;  %v3708_v56 = vpop.permute.xlu1 %980 }
 0x1ac   :  { %994 = vst.msk [vmem:[#allocation3 + $0x40] sm:$0xff] %vm951_vm3, %v3706_v15 }
 0x1ad   :  { %1339 = vrot.lane.b32.xlu0 %v3574_v27, %s3223_s8  ;;  %1411 = vrot.lane.b32.xlu1 %v3572_v10, %s3226_s11  ;;  %s3236_s8 = smov 32  }
 0x1af   :  { %v3715_v18 = vpop.permute.xlu0 %1001  ;;  %v3717_v19 = vpop.permute.xlu1 %1005  ;;  %v1486_v43 = vld [vmem:[#allocation3 + $0x28] sm:$0xff] }
 0x1b0   :  { %1015 = vst.msk [vmem:[#allocation3 + $0x58] sm:$0xff] %vm951_vm3, %v3717_v19 }
 0x1b1   :  { %1433 = vrot.lane.b32.xlu0 %v3570_v8, %s3227_s12  ;;  %1318 = vrot.lane.b32.xlu1 %v3574_v27, %s3222_s7  ;;  %s3235_s7 = smov 112  }
 0x1b3   :  { %v3725_v20 = vpop.permute.xlu0 %1026  ;;  %v3727_v21 = vpop.permute.xlu1 %1022  ;;  %v1489_v47 = vld [vmem:[#allocation3 + $0x40] sm:$0xff] }
 0x1b4   :  { %1036 = vst.msk [vmem:[#allocation3 + $0x70] sm:$0xff] %vm951_vm3, %v3725_v20 }
 0x1b5   :  { %1383 = vrot.lane.b32.xlu0 %v3574_v27, %s3225_s10  ;;  %1437 = vrot.lane.b32.xlu1 %v3572_v10, %s3227_s12 }
 0x1b7   :  { %v3735_v22 = vpop.permute.xlu0 %1043  ;;  %v3737_v23 = vpop.permute.xlu1 %1047  ;;  %v1492_v51 = vld [vmem:[#allocation3 + $0x58] sm:$0xff] }
 0x1b8   :  { %1057 = vst.msk [vmem:[#allocation3 + $0x88] sm:$0xff] %vm951_vm3, %v3737_v23 }
 0x1b9   :  { %1409 = vrot.lane.b32.xlu0 %v3574_v27, %s3226_s11  ;;  %1360 = vrot.lane.b32.xlu1 %v3574_v27, %s3224_s9 }
 0x1bb   :  { %v3745_v24 = vpop.permute.xlu0 %1068  ;;  %v3747_v25 = vpop.permute.xlu1 %1064  ;;  %v1495_v55 = vld [vmem:[#allocation3 + $0x70] sm:$0xff] }
 0x1bc   :  { %1078 = vst.msk [vmem:[#allocation3 + $0xa0] sm:$0xff] %vm951_vm3, %v3745_v24 }
 0x1bd   :  { %1435 = vrot.lane.b32.xlu0 %v3574_v27, %s3227_s12  ;;  %1463 = vrot.lane.b32.xlu1 %v3572_v10, %s3228_s13 }
 0x1bf   :  { %v3755_v26 = vpop.permute.xlu0 %1085  ;;  %v3757_v28 = vpop.permute.xlu1 %1089  ;;  %v1498_v16 = vld [vmem:[#allocation3 + $0x88] sm:$0xff] }
 0x1c0   :  { %1099 = vst.msk [vmem:[#allocation3 + $0xb8] sm:$0xff] %vm951_vm3, %v3757_v28 }
 0x1c1   :  { %1461 = vrot.lane.b32.xlu0 %v3574_v27, %s3228_s13  ;;  %1387 = vrot.lane.b32.xlu1 %v3576_v11, %s3225_s10  ;;  %s3238_s10 = smov 28  }
 0x1c3   :  { %v3765_v29 = vpop.permute.xlu0 %1110  ;;  %v3767_v30 = vpop.permute.xlu1 %1106  ;;  %v1501_v5 = vld [vmem:[#allocation3 + $0xa0] sm:$0xff] }
 0x1c4   :  { %1120 = vst.msk [vmem:[#allocation3 + $0xd0] sm:$0xff] %vm951_vm3, %v3765_v29 }
 0x1c5   :  { %1459 = vrot.lane.b32.xlu0 %v3570_v8, %s3228_s13  ;;  %1413 = vrot.lane.b32.xlu1 %v3576_v11, %s3226_s11 }
 0x1c7   :  { %v3778_v32 = vpop.permute.xlu0 %1127  ;;  %v3780_v33 = vpop.permute.xlu1 %1131 }
 0x1c8   :  { %1141 = vst.msk [vmem:[#allocation3 + $0xe8] sm:$0xff] %vm951_vm3, %v3780_v33 }
 0x1c9   :  { %1560 = vperm.xlu0 %3111, %v1556_v31   ;;  %1439 = vrot.lane.b32.xlu1 %v3576_v11, %s3227_s12 }
 0x1cb   :  { %v3786_v34 = vpop.permute.xlu0 %1152  ;;  %v1507_v35 = vld [vmem:[#allocation3 + $0xd0] sm:$0xff]  ;;  %v3788_v36 = vpop.permute.xlu1 %1148 }
 0x1cc   :  { %1162 = vst.msk [vmem:[#allocation3 + $0x100] sm:$0xff] %vm951_vm3, %v3786_v34  ;;  %2910 = vmatprep.subr.bf16.mxu1 %v1507_v35 }
 0x1cd   :  { %2911 = vmatpush3.bf16.msra.mxu1 %v1483_v37  ;;  %1465 = vrot.lane.b32.xlu1 %v3576_v11, %s3228_s13 }
 0x1cf   :  { %v3794_v39 = vpop.permute.xlu0 %1169  ;;  %v3799_v41 = vpop.permute.xlu1 %1173  ;;  %v1510_v42 = vld [vmem:[#allocation3 + $0xe8] sm:$0xff] }
 0x1d0   :  { %1183 = vst.msk [vmem:[#allocation3 + $0x118] sm:$0xff] %vm951_vm3, %v3799_v41  ;;  %2912 = vmatprep.subr.bf16.mxu1 %v1510_v42 }
 0x1d1   :  { %2913 = vmatpush3.bf16.msra.mxu1 %v1486_v43  ;;  %1565 = vperm.xlu1 %3112, %v1557_v40  }
 0x1d3   :  { %v3803_v44 = vpop.permute.xlu0 %1194  ;;  %v1513_v45 = vld [vmem:[#allocation3 + $0x100] sm:$0xff]  ;;  %v3805_v46 = vpop.permute.xlu1 %1190 }
 0x1d4   :  { %1204 = vst.msk [vmem:[#allocation3 + $0x130] sm:$0xff] %vm951_vm3, %v3803_v44  ;;  %2914 = vmatprep.subr.bf16.mxu1 %v1513_v45 }
 0x1d5   :  { %2915 = vmatpush3.bf16.msra.mxu1 %v1489_v47 }
 0x1d7   :  { %v3809_v48 = vpop.permute.xlu0 %1211  ;;  %v3811_v49 = vpop.permute.xlu1 %1215  ;;  %v1516_v50 = vld [vmem:[#allocation3 + $0x118] sm:$0xff] }
 0x1d8   :  { %1225 = vst.msk [vmem:[#allocation3 + $0x148] sm:$0xff] %vm951_vm3, %v3811_v49  ;;  %2916 = vmatprep.subr.bf16.mxu1 %v1516_v50 }
 0x1d9   :  { %2917 = vmatpush3.bf16.msra.mxu1 %v1492_v51 }
 0x1db   :  { %v3815_v52 = vpop.permute.xlu0 %1236  ;;  %v1519_v53 = vld [vmem:[#allocation3 + $0x130] sm:$0xff]  ;;  %v3817_v54 = vpop.permute.xlu1 %1232 }
 0x1dc   :  { %1246 = vst.msk [vmem:[#allocation3 + $0x160] sm:$0xff] %vm951_vm3, %v3815_v52  ;;  %2918 = vmatprep.subr.bf16.mxu1 %v1519_v53 }
 0x1dd   :  { %2919 = vmatpush3.bf16.msra.mxu1 %v1495_v55 }
 0x1df   :  { %v1004_v57 = vpop.permute.xlu0 %1003  ;;  %v962_v60 = vpop.permute.xlu1 %961  ;;  %v1522_v61 = vld [vmem:[#allocation3 + $0x148] sm:$0xff] }
 0x1e0   :  { %v1008_v58 = vsel %vm1007_vm4, %v3715_v18, %v1004_v57  ;;  %v1009_v59 = vsel %vm1007_vm4, %v1004_v57, %v3717_v19  ;;  %v966_v62 = vsel %vm965_vm5, %v3696_v13, %v962_v60  ;;  %v967_v63 = vsel %vm965_vm5, %v962_v60, %v3698_v14  ;;  %2920 = vmatprep.subr.bf16.mxu1 %v1522_v61  ;;  %v1504_v18 = vld [vmem:[#allocation3 + $0xb8] sm:$0xff]  ;;  %v3854_v19 = vld [vmem:[%s4229_s1 + $0x20] ss:$16 sps:$4 sm:$0xff]  }
 0x1e1   :  { %2921 = vmatpush3.bf16.msra.mxu1 %v1498_v16  ;;  %1592 = vmatprep.subr.bf16.mxu0 %v967_v63  ;;  %vm1301_vm4 = vcmask 326656  }
 0x1e2   :  { %1593 = vmatpush1.bf16.msra.mxu0 %v966_v62 }
 0x1e3   :  { %v3827_v17 = vpop.permute.xlu0 %1253  ;;  %v1525_v0 = vld [vmem:[#allocation3 + $0x160] sm:$0xff]  ;;  %v983_v1 = vpop.permute.xlu1 %982 }
 0x1e4   :  { %2922 = vmatprep.subr.bf16.mxu1 %v1525_v0  ;;  %v987_v2 = vsel %vm986_vm6, %v3708_v56, %v983_v1  ;;  %v988_v4 = vsel %vm986_vm6, %v983_v1, %v3706_v15  ;;  %vm1280_vm6 = vcmask 343040  }
 0x1e5   :  { %2923 = vmatpush3.bf16.msra.mxu1 %v1501_v5  ;;  %1594 = vmatprep.subr.bf16.mxu0 %v988_v4 }
 0x1e6   :  { %1595 = vmatpush1.bf16.msra.mxu0 %v987_v2 }
 0x1e7   :  { %v1046_v38 = vpop.permute.xlu0 %1045  ;;  %v3835_v8 = vpop.permute.xlu1 %1257  ;;  %1596 = vmatprep.subr.bf16.mxu0 %v1009_v59 }
 0x1e8   :  { %v1050_v6 = vsel %vm1049_vm7, %v3735_v22, %v1046_v38  ;;  %v1051_v7 = vsel %vm1049_vm7, %v1046_v38, %v3737_v23  ;;  %1267 = vst.msk [vmem:[#allocation3 + $0x178] sm:$0xff] %vm951_vm3, %v3835_v8 }
 0x1ea   :  { %1597 = vmatpush1.bf16.msra.mxu0 %v1008_v58 }
 0x1eb   :  { %v3839_v9 = vpop.permute.xlu0 %1278  ;;  %v1025_v10 = vpop.permute.xlu1 %1024 }
 0x1ec   :  { %1288 = vst.msk [vmem:[#allocation3 + $0x190] sm:$0xff] %vm951_vm3, %v3839_v9  ;;  %v1029_v27 = vsel %vm1028_vm8, %v3727_v21, %v1025_v10  ;;  %v1030_v11 = vsel %vm1028_vm8, %v1025_v10, %v3725_v20 }
 0x1ed   :  { %1598 = vmatprep.subr.bf16.mxu0 %v1030_v11 }
 0x1ee   :  { %1599 = vmatpush1.bf16.msra.mxu0 %v1029_v27 }
 0x1ef   :  { %v1088_v12 = vpop.permute.xlu0 %1087  ;;  %v3849_v15 = vpop.permute.xlu1 %1274  ;;  %v1528_v56 = vld [vmem:[#allocation3 + $0x178] sm:$0xff]  ;;  %1600 = vmatprep.subr.bf16.mxu0 %v1051_v7 }
 0x1f0   :  { %v1092_v13 = vsel %vm1091_vm9, %v3755_v26, %v1088_v12  ;;  %v1093_v14 = vsel %vm1091_vm9, %v1088_v12, %v3757_v28  ;;  %2924 = vmatprep.subr.bf16.mxu1 %v1528_v56  ;;  %v3865_v28 = vld [vmem:[%s4229_s1 + $0x2c] ss:$16 sps:$4 sm:$0xff]   ;;  %vm1343_vm9 = vcmask 293888  }
 0x1f1   :  { %2925 = vmatpush3.bf16.msra.mxu1 %v1504_v18 }
 0x1f2   :  { %1717 = vmatprep.subr.bf16.mxu1 %v3203_v3  ;;  %1601 = vmatpush1.bf16.msra.mxu0 %v1050_v6 }
 0x1f3   :  { %v3856_v20 = vpop.permute.xlu0 %1295  ;;  %v1531_v21 = vld [vmem:[#allocation3 + $0x190] sm:$0xff]  ;;  %v1067_v22 = vpop.permute.xlu1 %1066 }
 0x1f4   :  { %v1071_v23 = vsel %vm1070_vm10, %v3747_v25, %v1067_v22  ;;  %v1072_v26 = vsel %vm1070_vm10, %v1067_v22, %v3745_v24  ;;  %1709 = vmatmul.mubr.bf16.vlgmr.msra.gmra.mrb[16].mxu1 %v3854_v19  ;;  %vm1322_vm10 = vcmask 310272  }
 0x1f5   :  { %1718 = vmatpush1.bf16.msra.mxu1 %v1531_v21  ;;  %1602 = vmatprep.subr.bf16.mxu0 %v1072_v26 }
 0x1f6   :  { %1603 = vmatpush1.bf16.msra.mxu0 %v1071_v23  ;;  %1719 = vmatprep.subr.bf16.mxu1 %v3203_v3 }
 0x1f7   :  { %v1130_v31 = vpop.permute.xlu0 %1129  ;;  %v3870_v37 = vpop.permute.xlu1 %1299  ;;  %1604 = vmatprep.subr.bf16.mxu0 %v1093_v14  ;;  %2855 = vmatprep.mubr.msk.bf16.mxu1 %vm951_vm3, %v3865_v28 }
 0x1f8   :  { %v1134_v35 = vsel %vm1133_vm11, %v3778_v32, %v1130_v31  ;;  %v1135_v25 = vsel %vm1133_vm11, %v1130_v31, %v3780_v33  ;;  %1309 = vst.msk [vmem:[#allocation3 + $0x1a8] sm:$0xff] %vm951_vm3, %v3870_v37  ;;  %vm1389_vm11 = vcmask 113664  }
 0x1fa   :  { %1605 = vmatpush1.bf16.msra.mxu0 %v1092_v13 }
 0x1fb   :  { %v3876_v24 = vpop.permute.xlu0 %1320  ;;  %v1109_v40 = vpop.permute.xlu1 %1108 }
 0x1fc   :  { %1330 = vst.msk [vmem:[#allocation3 + $0x1c0] sm:$0xff] %vm951_vm3, %v3876_v24  ;;  %v1113_v32 = vsel %vm1112_vm12, %v3767_v30, %v1109_v40  ;;  %v1114_v33 = vsel %vm1112_vm12, %v1109_v40, %v3765_v29  ;;  %vm1415_vm12 = vcmask 97280  }
 0x1fd   :  { %1606 = vmatprep.subr.bf16.mxu0 %v1114_v33 }
 0x1fe   :  { %1607 = vmatpush1.bf16.msra.mxu0 %v1113_v32 }
 0x1ff   :  { %v1172_v42 = vpop.permute.xlu0 %1171  ;;  %v3884_v47 = vpop.permute.xlu1 %1316  ;;  %v1534_v50 = vld [vmem:[#allocation3 + $0x1a8] sm:$0xff]  ;;  %1608 = vmatprep.subr.bf16.mxu0 %v1135_v25 }
 0x200   :  { %v1176_v43 = vsel %vm1175_vm13, %v3794_v39, %v1172_v42  ;;  %v1177_v45 = vsel %vm1175_vm13, %v1172_v42, %v3799_v41  ;;  %1720 = vmatpush1.bf16.msra.mxu1 %v1534_v50  ;;  %vm1441_vm13 = vcmask 80896  }
 0x201   :  { %1721 = vmatprep.subr.bf16.mxu1 %v3203_v3 }
 0x202   :  { %1609 = vmatpush1.bf16.msra.mxu0 %v1134_v35 }
 0x203   :  { %v3887_v51 = vpop.permute.xlu0 %1337  ;;  %v1537_v30 = vld [vmem:[#allocation3 + $0x1c0] sm:$0xff]  ;;  %v1151_v29 = vpop.permute.xlu1 %1150 }
 0x204   :  { %v1155_v53 = vsel %vm1154_vm14, %v3788_v36, %v1151_v29  ;;  %v1156_v55 = vsel %vm1154_vm14, %v1151_v29, %v3786_v34  ;;  %1722 = vmatpush1.bf16.msra.mxu1 %v1537_v30  ;;  %vm1467_vm14 = vcmask 64512   ;;  %v3149_v30 = vld [vmem:[%s4229_s1 + $0x28] ss:$16 sps:$4 sm:$0xff]  }
 0x205   :  { %1610 = vmatprep.subr.bf16.mxu0 %v1156_v55  ;;  %1723 = vmatprep.subr.bf16.mxu1 %v3203_v3 }
 0x206   :  { %1611 = vmatpush1.bf16.msra.mxu0 %v1155_v53 }
 0x207   :  { %v1214_v39 = vpop.permute.xlu0 %1213  ;;  %v1342_v58 = vpop.permute.xlu1 %1341  ;;  %1612 = vmatprep.subr.bf16.mxu0 %v1177_v45 }
 0x208   :  { %v1218_v41 = vsel %vm1217_vm15, %v3809_v48, %v1214_v39  ;;  %v1219_v57 = vsel %vm1217_vm15, %v1214_v39, %v3811_v49  ;;  %1351 = vst.msk [vmem:[#allocation3 + $0x1d8] sm:$0xff] %vm951_vm3, %v1342_v58  ;;  %vm2705_vm15 = vcmask 687104  }
 0x20a   :  { %1613 = vmatpush1.bf16.msra.mxu0 %v1176_v43 }
 0x20b   :  { %v3895_v59 = vpop.permute.xlu0 %1362  ;;  %v1193_v34 = vpop.permute.xlu1 %1192 }
 0x20c   :  { %1372 = vst.msk [vmem:[#allocation3 + $0x1f0] sm:$0xff] %vm951_vm3, %v3895_v59  ;;  %v1197_v36 = vsel %vm1196_vm0, %v3805_v46, %v1193_v34  ;;  %v1198_v60 = vsel %vm1196_vm0, %v1193_v34, %v3803_v44  ;;  %vm2755_vm0 = vcmask 9216  }
 0x20d   :  { %1614 = vmatprep.subr.bf16.mxu0 %v1198_v60 }
 0x20e   :  { %1615 = vmatpush1.bf16.msra.mxu0 %v1197_v36 }
 0x20f   :  { %v1256_v48 = vpop.permute.xlu0 %1255  ;;  %v1359_v62 = vpop.permute.xlu1 %1358  ;;  %v1540_v63 = vld [vmem:[#allocation3 + $0x1d8] sm:$0xff]  ;;  %1616 = vmatprep.subr.bf16.mxu0 %v1219_v57 }
 0x210   :  { %v1260_v49 = vsel %vm1259_vm1, %v3827_v17, %v1256_v48  ;;  %v1261_v61 = vsel %vm1259_vm1, %v1256_v48, %v3835_v8  ;;  %1724 = vmatpush1.bf16.msra.mxu1 %v1540_v63 }
 0x211   :  { %1725 = vmatprep.subr.bf16.mxu1 %v3203_v3 }
 0x212   :  { %1617 = vmatpush1.bf16.msra.mxu0 %v1218_v41 }
 0x213   :  { %v1382_v16 = vpop.permute.xlu0 %1381  ;;  %v1543_v0 = vld [vmem:[#allocation3 + $0x1f0] sm:$0xff]  ;;  %v1235_v46 = vpop.permute.xlu1 %1234 }
 0x214   :  { %v1239_v44 = vsel %vm1238_vm2, %v3817_v54, %v1235_v46  ;;  %v1240_v1 = vsel %vm1238_vm2, %v1235_v46, %v3815_v52  ;;  %1726 = vmatpush1.bf16.msra.mxu1 %v1543_v0 }
 0x215   :  { %1618 = vmatprep.subr.bf16.mxu0 %v1240_v1  ;;  %1727 = vmatprep.subr.bf16.mxu1 %v3203_v3 }
 0x216   :  { %1619 = vmatpush1.bf16.msra.mxu0 %v1239_v44 }
 0x217   :  { %v1298_v17 = vpop.permute.xlu0 %1297  ;;  %v1386_v5 = vpop.permute.xlu1 %1385  ;;  %1620 = vmatprep.subr.bf16.mxu0 %v1261_v61 }
 0x218   :  { %v1302_v2 = vsel %vm1301_vm4, %v3856_v20, %v1298_v17  ;;  %v1303_v4 = vsel %vm1301_vm4, %v1298_v17, %v3870_v37 }
 0x21a   :  { %1621 = vmatpush1.bf16.msra.mxu0 %v1260_v49 }
 0x21b   :  { %v1408_v38 = vpop.permute.xlu0 %1407  ;;  %v1277_v6 = vpop.permute.xlu1 %1276 }
 0x21c   :  { %v1281_v54 = vsel %vm1280_vm6, %v3849_v15, %v1277_v6  ;;  %v1282_v52 = vsel %vm1280_vm6, %v1277_v6, %v3839_v9 }
 0x21d   :  { %1633 = vmatprep.subr.bf16.mxu0 %v1282_v52  ;;  %1623 = vmatmul.mubr.bf16.vlgmr.msra.gmra.mrb[16].mxu0 %v3854_v19 }
 0x21e   :  { %1634 = vmatpush1.bf16.msra.mxu0 %v1281_v54  ;;  %2854 = vmatprep.mubr.msk.bf16.mxu0 %vm951_vm3, %v3865_v28 }
 0x21f   :  { %v1340_v7 = vpop.permute.xlu0 %1339  ;;  %v1412_v27 = vpop.permute.xlu1 %1411  ;;  %1635 = vmatprep.subr.bf16.mxu0 %v1303_v4 }
 0x220   :  { %v1344_v8 = vsel %vm1343_vm9, %v3887_v51, %v1340_v7  ;;  %v1345_v10 = vsel %vm1343_vm9, %v1340_v7, %v1342_v58 }
 0x222   :  { %1636 = vmatpush1.bf16.msra.mxu0 %v1302_v2 }
 0x223   :  { %v1434_v11 = vpop.permute.xlu0 %1433  ;;  %v1319_v12 = vpop.permute.xlu1 %1318 }
 0x224   :  { %v1323_v9 = vsel %vm1322_vm10, %v3884_v47, %v1319_v12  ;;  %v1324_v13 = vsel %vm1322_vm10, %v1319_v12, %v3876_v24 }
 0x225   :  { %1637 = vmatprep.subr.bf16.mxu0 %v1324_v13 }
 0x226   :  { %1638 = vmatpush1.bf16.msra.mxu0 %v1323_v9 }
 0x227   :  { %v1384_v14 = vpop.permute.xlu0 %1383  ;;  %v1438_v18 = vpop.permute.xlu1 %1437  ;;  %1639 = vmatprep.subr.bf16.mxu0 %v1345_v10 }
 0x228   :  { %v1390_v15 = vsel %vm1389_vm11, %v1382_v16, %v1384_v14  ;;  %v1391_v56 = vsel %vm1389_vm11, %v1384_v14, %v1386_v5 }
 0x22a   :  { %1640 = vmatpush1.bf16.msra.mxu0 %v1344_v8 }
 0x22b   :  { %v1410_v19 = vpop.permute.xlu0 %1409  ;;  %v1361_v22 = vpop.permute.xlu1 %1360 }
 0x22c   :  { %v1416_v20 = vsel %vm1415_vm12, %v1408_v38, %v1410_v19  ;;  %v1417_v21 = vsel %vm1415_vm12, %v1410_v19, %v1412_v27  ;;  %v1365_v23 = vsel %vm951_vm3, %v1359_v62, %v1361_v22  ;;  %v1366_v26 = vsel %vm951_vm3, %v1361_v22, %v3895_v59 }
 0x22d   :  { %1641 = vmatprep.subr.bf16.mxu0 %v1366_v26 }
 0x22e   :  { %1642 = vmatpush1.bf16.msra.mxu0 %v1365_v23 }
 0x22f   :  { %v1436_v28 = vpop.permute.xlu0 %1435  ;;  %v1464_v25 = vpop.permute.xlu1 %1463  ;;  %1643 = vmatprep.subr.bf16.mxu0 %v1391_v56 }
 0x230   :  { %v1442_v31 = vsel %vm1441_vm13, %v1434_v11, %v1436_v28  ;;  %v1443_v35 = vsel %vm1441_vm13, %v1436_v28, %v1438_v18 }
 0x232   :  { %1644 = vmatpush1.bf16.msra.mxu0 %v1390_v15 }
 0x233   :  { %v1462_v37 = vpop.permute.xlu0 %1461  ;;  %v1388_v40 = vpop.permute.xlu1 %1387  ;;  %1645 = vmatprep.subr.bf16.mxu0 %v1417_v21 }
 0x234   :  { %v1469_v24 = vsel %vm1467_vm14, %v1462_v37, %v1464_v25  ;;  %v1392_v32 = vsel %vm1389_vm11, %v1386_v5, %v1388_v40 }
 0x235   :  { %1398 = vst.msk [vmem:[#allocation3 + $0x208] sm:$0xff] %vm951_vm3, %v1392_v32 }
 0x236   :  { %1646 = vmatpush1.bf16.msra.mxu0 %v1416_v20 }
 0x237   :  { %v1460_v33 = vpop.permute.xlu0 %1459  ;;  %v1414_v43 = vpop.permute.xlu1 %1413  ;;  %1647 = vmatprep.subr.bf16.mxu0 %v1443_v35 }
 0x238   :  { %v1468_v42 = vsel %vm1467_vm14, %v1460_v33, %v1462_v37  ;;  %v1418_v45 = vsel %vm1415_vm12, %v1412_v27, %v1414_v43 }
 0x239   :  { %1424 = vst.msk [vmem:[#allocation3 + $0x220] sm:$0xff] %vm951_vm3, %v1418_v45 }
 0x23a   :  { %1648 = vmatpush1.bf16.msra.mxu0 %v1442_v31 }
 0x23b   :  { %v1440_v47 = vpop.permute.xlu1 %1439  ;;  %1649 = vmatprep.subr.bf16.mxu0 %v1469_v24 }
 0x23c   :  { %v1444_v50 = vsel %vm1441_vm13, %v1438_v18, %v1440_v47  ;;  %v1546_v51 = vld [vmem:[#allocation3 + $0x208] sm:$0xff] }
 0x23d   :  { %1450 = vst.msk [vmem:[#allocation3 + $0x238] sm:$0xff] %vm951_vm3, %v1444_v50  ;;  %1728 = vmatpush1.bf16.msra.mxu1 %v1546_v51 }
 0x23e   :  { %1729 = vmatprep.subr.bf16.mxu1 %v3203_v3  ;;  %1650 = vmatpush1.bf16.msra.mxu0 %v1468_v42 }
 0x23f   :  { %v1466_v29 = vpop.permute.xlu1 %1465  ;;  %2342 = vmatprep.subr.bf16.mxu0 %v3203_v3 }
 0x240   :  { %v1470_v53 = vsel %vm1467_vm14, %v1464_v25, %v1466_v29  ;;  %v1549_v55 = vld [vmem:[#allocation3 + $0x220] sm:$0xff] }
 0x241   :  { %1476 = vst.msk [vmem:[#allocation3 + $0x250] sm:$0xff] %vm951_vm3, %v1470_v53  ;;  %1730 = vmatpush1.bf16.msra.mxu1 %v1549_v55  ;;  %1666 = vmatmul.mubr.bf16.vlgmr.msra.gmra.mrb[16].mxu0 %v3149_v30 }
 0x242   :  { %1731 = vmatprep.subr.bf16.mxu1 %v3203_v3 }
 0x244   :  { %v1552_v39 = vld [vmem:[#allocation3 + $0x238] sm:$0xff] }
 0x245   :  { %1732 = vmatpush1.bf16.msra.mxu1 %v1552_v39 }
 0x246   :  { %1733 = vmatprep.subr.bf16.mxu1 %v3203_v3 }
 0x248   :  { %v1555_v41 = vld [vmem:[#allocation3 + $0x250] sm:$0xff]  ;;  %v1561_v48 = vpop.permute.xlu0 %1560 }
 0x249   :  { %1734 = vmatpush1.bf16.msra.mxu1 %v1555_v41 }
 0x24c   :  { %1750 = vmatmul.mubr.bf16.vlgmr.msra.gmra.mrb[20].mxu1 %v3149_v30 }
 0x250   :  { %v1566_v63 = vpop.permute.xlu1 %1565 }
 0x2c7   :  { %v2926_v57 = vpop.f32.mrb[16].mxu1 }
 0x2c8   :  { %v2927_v58 = vpop.f32.mrb[17].mxu1 }
 0x2c9   :  { %v2928_v59 = vadd.f32 %v2927_v58, %v2926_v57  ;;  %v2929_v34 = vpop.f32.mrb[18].mxu1 }
 0x2ca   :  { %v2930_v36 = vpop.f32.mrb[19].mxu1 }
 0x2cb   :  { %v2931_v60 = vadd.f32 %v2930_v36, %v2929_v34  ;;  %v1711_v4 = vadd.f32 %v2928_v59, %v1561_v48 }
 0x2cd   :  { %v1714_v54 = vadd.f32 %v2931_v60, %v1566_v63 }
 0x314   :  { %v1667_v49 = vpop.f32.mrb[16].mxu0 }
 0x315   :  { %v3061_v61 = vadd.f32 %v1667_v49, %v1561_v48  ;;  %v1669_v62 = vpop.f32.mrb[17].mxu0 }
 0x316   :  { %v3943_v16 = vadd.f32 %v1669_v62, %v1561_v48  ;;  %v1671_v0 = vpop.f32.mrb[18].mxu0 }
 0x317   :  { %v3063_v46 = vadd.f32 %v1671_v0, %v1566_v63  ;;  %v1673_v44 = vpop.f32.mrb[19].mxu0  ;;  %v3153_v0 = vld [vmem:[%s4229_s1 + $0x4c] ss:$16 sps:$4 sm:$0xff]  }
 0x318   :  { %v3064_v1 = vadd.f32 %v1673_v44, %v1566_v63  ;;  %v3113_v17 = vpack.i.bf16 %v3943_v16, %v3061_v61  ;;  %v1987_v44 = vld [vmem:[%s4230_s2 + $0x28] sm:$0xff]  ;;  %2888 = vmatprep.mubr.msk.bf16.mxu0 %vm951_vm3, %v3153_v0 }
 0x31a   :  { %3114 = vrot.lane.b32.xlu0 %v3113_v17, %s3205_s0  ;;  %v3118_v2 = vpack.i.bf16 %v3064_v1, %v3063_v46  ;;  %v1989_v17 = vld [vmem:[%s4230_s2 + $0x38] sm:$0xff] }
 0x31c   :  { %3119 = vrot.lane.b32.xlu1 %v3118_v2, %s3205_s0  ;;  %v1990_v2 = vld [vmem:[%s4230_s2 + $0x40] sm:$0xff] }
 0x31f   :  { %v1751_v5 = vpop.f32.mrb[20].mxu1 }
 0x320   :  { %v1752_v38 = vadd.f32 %v1751_v5, %v1711_v4  ;;  %v1753_v6 = vpop.f32.mrb[21].mxu1  ;;  %v1991_v4 = vld [vmem:[%s4230_s2 + $0x48] sm:$0xff]  ;;  %v1992_v5 = vld [vmem:[%s4230_s2 + $0x50] sm:$0xff] }
 0x321   :  { %v1754_v52 = vpop.f32.mrb[22].mxu1  ;;  %v1994_v6 = vld [vmem:[%s4230_s2 + $0x60] sm:$0xff] }
 0x322   :  { %v1755_v7 = vadd.f32 %v1754_v52, %v1714_v54  ;;  %v1756_v8 = vpop.f32.mrb[23].mxu1  ;;  %v1995_v54 = vld [vmem:[%s4230_s2 + $0x68] sm:$0xff]  ;;  %v1996_v52 = vld [vmem:[%s4230_s2 + $0x70] sm:$0xff] }
 0x323   :  { %v1998_v8 = vld [vmem:[%s4230_s2 + $0x80] sm:$0xff] }
 0x324   :  { %v3123_v10 = vpack.i.bf16 %v1755_v7, %v1752_v38 }
 0x326   :  { %3124 = vrot.lane.b32.xlu0 %v3123_v10, %s3205_s0  ;;  %s3229_s0 = smov 60   ;;  %v1999_v10 = vld [vmem:[%s4230_s2 + $0x88] sm:$0xff] }
 0x38c   :  { %v3115_v27 = vpop.permute.xlu0 %3114 }
 0x38d   :  { %v3117_v12 = vunpack.i.h.bf16 %v3115_v27  ;;  %v3116_v9 = vunpack.i.l.bf16 %v3115_v27  ;;  %v2000_v27 = vld [vmem:[%s4230_s2 + $0x90] sm:$0xff] }
 0x38e   :  { %v3120_v11 = vpop.permute.xlu1 %3119 }
 0x38f   :  { %v3122_v13 = vunpack.i.h.bf16 %v3120_v11  ;;  %v3121_v14 = vunpack.i.l.bf16 %v3120_v11  ;;  %v1771_v56 = vsel %vm965_vm5, %v3116_v9, %v3117_v12  ;;  %v1778_v41 = vmax.f32 %v3943_v16, %v3117_v12  ;;  %v2472_v11 = vld [vmem:[%s4230_s2 + $0x98] sm:$0xff]  ;;  %v2474_v9 = vld [vmem:[%s4230_s2 + $0xa8] sm:$0xff] }
 0x390   :  { %v1777_v28 = vmax.f32 %v3061_v61, %v1771_v56  ;;  %v2478_v56 = vld [vmem:[%s4230_s2 + $0xc8] sm:$0xff] }
 0x391   :  { %v1772_v18 = vsel %vm965_vm5, %v3121_v14, %v3122_v13  ;;  %v1780_v57 = vmax.f32 %v3064_v1, %v3122_v13  ;;  %v2476_v14 = vld [vmem:[%s4230_s2 + $0xb8] sm:$0xff] }
 0x392   :  { %v1779_v23 = vmax.f32 %v3063_v46, %v1772_v18  ;;  %v1986_v46 = vld [vmem:[%s4230_s2 + $0x20] sm:$0xff]  ;;  %v2479_v18 = vld [vmem:[%s4230_s2 + $0xd0] sm:$0xff] }
 0x398   :  { %v3125_v15 = vpop.permute.xlu0 %3124 }
 0x399   :  { %v3127_v19 = vunpack.i.h.bf16 %v3125_v15  ;;  %v3126_v20 = vunpack.i.l.bf16 %v3125_v15  ;;  %v2477_v15 = vld [vmem:[%s4230_s2 + $0xc0] sm:$0xff] }
 0x39b   :  { %v1788_v21 = vsel %vm965_vm5, %v3122_v13, %v3127_v19  ;;  %v1787_v22 = vsel %vm965_vm5, %v3117_v12, %v3126_v20  ;;  %v1796_v35 = vmax.f32 %v1755_v7, %v3127_v19  ;;  %v1794_v25 = vmax.f32 %v1752_v38, %v3126_v20  ;;  %v1993_v38 = vld [vmem:[%s4230_s2 + $0x58] sm:$0xff]  ;;  %v2473_v12 = vld [vmem:[%s4230_s2 + $0xa0] sm:$0xff]  ;;  %v2475_v13 = vld [vmem:[%s4230_s2 + $0xb0] sm:$0xff] }
 0x39c   :  { %v1795_v26 = vmax.f32 %v3064_v1, %v1788_v21  ;;  %v1793_v31 = vmax.f32 %v3943_v16, %v1787_v22  ;;  %vm1834_vm5 = vcmask 15360   ;;  %v3152_v16 = vld [vmem:[%s4229_s1 + $0x44] ss:$16 sps:$4 sm:$0xff]   ;;  %v1997_v7 = vld [vmem:[%s4230_s2 + $0x78] sm:$0xff]  ;;  %v2482_v21 = vld [vmem:[%s4230_s2 + $0xe8] sm:$0xf] }
 0x39d   :  { %v3138_v40 = vpack.i.bf16 %v1796_v35, %v1794_v25  ;;  %2278 = vmatprep.mubr.bf16.mxu1 %v3152_v16  ;;  %v1988_v1 = vld [vmem:[%s4230_s2 + $0x30] sm:$0xff]  ;;  %v2480_v19 = vld [vmem:[%s4230_s2 + $0xd8] sm:$0xff]  ;;  %v2481_v20 = vld [vmem:[%s4230_s2 + $0xe0] sm:$0xff] }
 0x39e   :  { %v3133_v37 = vpack.i.bf16 %v1795_v26, %v1779_v23  ;;  %v3128_v24 = vpack.i.bf16 %v1793_v31, %v1777_v28  ;;  %v2688_v22 = vld [vmem:[%s4230_s2 + $0xf0] sm:$0xff] }
 0x3a0   :  { %3134 = vrot.lane.b32.xlu0 %v3133_v37, %s3209_s19  ;;  %3129 = vrot.lane.b32.xlu1 %v3128_v24, %s3209_s19 }
 0x3a4   :  { %3139 = vrot.lane.b32.xlu1 %v3138_v40, %s3209_s19  ;;  %s3230_s19 = smov 84  }
 0x412   :  { %v3135_v32 = vpop.permute.xlu0 %3134  ;;  %v3130_v33 = vpop.permute.xlu1 %3129 }
 0x413   :  { %v3137_v42 = vunpack.i.h.bf16 %v3135_v32  ;;  %v3136_v43 = vunpack.i.l.bf16 %v3135_v32  ;;  %v3132_v45 = vunpack.i.h.bf16 %v3130_v33  ;;  %v3131_v47 = vunpack.i.l.bf16 %v3130_v33 }
 0x415   :  { %v1818_v50 = vsel %vm1049_vm7, %v3136_v43, %v3137_v42  ;;  %v1816_v51 = vsel %vm1049_vm7, %v3131_v47, %v3132_v45 }
 0x416   :  { %v1826_v30 = vmax.f32 %v1779_v23, %v1818_v50  ;;  %v1824_v29 = vmax.f32 %v1777_v28, %v1816_v51  ;;  %v3140_v53 = vpop.permute.xlu1 %3139  ;;  %v2689_v23 = vld [vmem:[%s4230_s2 + $0xf8] sm:$0x3] }
 0x417   :  { %v3142_v55 = vunpack.i.h.bf16 %v3140_v53  ;;  %v3141_v39 = vunpack.i.l.bf16 %v3140_v53 }
 0x418   :  { %v1830_v58 = vmax.f32 %v1826_v30, 0.0  ;;  %v1828_v59 = vmax.f32 %v1824_v29, 0.0 }
 0x419   :  { %v1819_v34 = vsel %vm1049_vm7, %v3137_v42, %v3142_v55  ;;  %v1817_v36 = vsel %vm1049_vm7, %v3132_v45, %v3141_v39  ;;  %vm3243_vm7 = vmmov 0  }
 0x41a   :  { %v1832_v60 = vpack.c.bf16 %v1830_v58, %v1828_v59  ;;  %v1827_v48 = vmax.f32 %v1780_v57, %v1819_v34  ;;  %v1825_v49 = vmax.f32 %v1778_v41, %v1817_v36 }
 0x41c   :  { %v1831_v61 = vmax.f32 %v1827_v48, 0.0  ;;  %v1829_v62 = vmax.f32 %v1825_v49, 0.0  ;;  %1865 = vrot.lane.b32.xlu0 %v1832_v60, %s3229_s0  ;;  %1835 = vst.msk [vmem:[#allocation4] sm:$0xff] %vm1834_vm5, %v1832_v60 }
 0x41e   :  { %v1833_v63 = vpack.c.bf16 %v1831_v61, %v1829_v62 }
 0x420   :  { %1895 = vrot.lane.b32.xlu1 %v1833_v63, %s3230_s19  ;;  %1869 = vrot.lane.b32.xlu0 %v1832_v60, %s3231_s30  ;;  %1889 = vst.msk [vmem:[#allocation4 + $0x70] sm:$0xff] %vm1834_vm5, %v1833_v63 }
 0x423   :  { %v1961_v24 = vld [vmem:[#allocation4] sm:$0xff] }
 0x424   :  { %1837 = vrot.lane.b32.xlu1 %v1832_v60, %s3206_s16  ;;  %1899 = vrot.lane.b32.xlu0 %v1833_v63, %s3232_s4  ;;  %s3237_s16 = smov 4  }
 0x428   :  { %1873 = vrot.lane.b32.xlu1 %v1832_v60, %s3224_s9  ;;  %1841 = vrot.lane.b32.xlu0 %v1832_v60, %s3208_s18  ;;  %s3239_s18 = smov 24  }
 0x42c   :  { %1903 = vrot.lane.b32.xlu1 %v1833_v63, %s3233_s5  ;;  %1877 = vrot.lane.b32.xlu0 %v1832_v60, %s3226_s11 }
 0x430   :  { %1845 = vrot.lane.b32.xlu1 %v1832_v60, %s3234_s6  ;;  %1907 = vrot.lane.b32.xlu0 %v1833_v63, %s3214_s24 }
 0x434   :  { %1881 = vrot.lane.b32.xlu1 %v1832_v60, %s3228_s13  ;;  %1849 = vrot.lane.b32.xlu0 %v1832_v60, %s3235_s7  ;;  %s3240_s13 = smov 88  }
 0x438   :  { %1911 = vrot.lane.b32.xlu1 %v1833_v63, %s3236_s8  ;;  %1885 = vrot.lane.b32.xlu0 %v1832_v60, %s3237_s16 }
 0x43c   :  { %1853 = vrot.lane.b32.xlu1 %v1832_v60, %s3214_s24  ;;  %1915 = vrot.lane.b32.xlu0 %v1833_v63, %s3238_s10  ;;  %s3241_s24 = smov 20  }
 0x440   :  { %1857 = vrot.lane.b32.xlu1 %v1832_v60, %s3216_s26  ;;  %1919 = vrot.lane.b32.xlu0 %v1833_v63, %s3239_s18 }
 0x444   :  { %1891 = vrot.lane.b32.xlu1 %v1833_v63, %s3240_s13  ;;  %1861 = vrot.lane.b32.xlu0 %v1832_v60, %s3218_s28 }
 0x448   :  { %1923 = vrot.lane.b32.xlu1 %v1833_v63, %s3241_s24  ;;  %1927 = vrot.lane.b32.xlu0 %v1833_v63, %s3224_s9 }
 0x44c   :  { %2003 = vperm.xlu1 %3112, %v1986_v46   ;;  %2008 = vperm.xlu0 %3111, %v1987_v44  }
 0x450   :  { %2013 = vperm.xlu1 %3112, %v1988_v1   ;;  %2018 = vperm.xlu0 %3111, %v1989_v17  }
 0x454   :  { %2023 = vperm.xlu1 %3112, %v1990_v2   ;;  %2028 = vperm.xlu0 %3111, %v1991_v4   ;;  %v1975_v2 = vld [vmem:[#allocation4 + $0x70] sm:$0xff] }
 0x458   :  { %2033 = vperm.xlu1 %3112, %v1992_v5   ;;  %2038 = vperm.xlu0 %3111, %v1993_v38  }
 0x45c   :  { %2043 = vperm.xlu1 %3112, %v1994_v6   ;;  %2048 = vperm.xlu0 %3111, %v1995_v54  }
 0x460   :  { %2053 = vperm.xlu1 %3112, %v1996_v52   ;;  %2058 = vperm.xlu0 %3111, %v1997_v7   ;;  %v3150_v7 = vld [vmem:[%s4229_s1 + $0x40] ss:$16 sps:$4 sm:$0xff]  }
 0x464   :  { %2063 = vperm.xlu1 %3112, %v1998_v8   ;;  %2068 = vperm.xlu0 %3111, %v1999_v10   ;;  %v3155_v8 = vld [vmem:[%s4229_s1 + $0x64] ss:$16 sps:$4 sm:$0xff]  }
 0x468   :  { %2073 = vperm.xlu1 %3112, %v2000_v27   ;;  %2485 = vperm.xlu0 %3111, %v2472_v11   ;;  %v3157_v11 = vld [vmem:[%s4229_s1 + $0x48] ss:$16 sps:$4 sm:$0xff]  }
 0x46c   :  { %2490 = vperm.xlu1 %3112, %v2473_v12   ;;  %2495 = vperm.xlu0 %3111, %v2474_v9   ;;  %v3158_v12 = vld [vmem:[%s4229_s1 + $0x60] ss:$16 sps:$4 sm:$0xff]   ;;  %v3159_v9 = vld [vmem:[%s4229_s1 + $0x6c] ss:$16 sps:$4 sm:$0xff]  }
 0x470   :  { %2500 = vperm.xlu1 %3112, %v2475_v13   ;;  %2505 = vperm.xlu0 %3111, %v2476_v14   ;;  %v3161_v13 = vld [vmem:[%s4229_s1 + $0x84] ss:$16 sps:$4 sm:$0xff]   ;;  %v3164_v14 = vld [vmem:[%s4229_s1 + $0x80] ss:$16 sps:$4 sm:$0xff]  }
 0x474   :  { %2510 = vperm.xlu1 %3112, %v2477_v15   ;;  %2515 = vperm.xlu0 %3111, %v2478_v56   ;;  %v3165_v15 = vld [vmem:[%s4229_s1 + $0x8c] ss:$16 sps:$4 sm:$0xff]   ;;  %v3167_v56 = vld [vmem:[%s4229_s1 + $0xa4] ss:$16 sps:$4 sm:$0xff]  }
 0x478   :  { %2520 = vperm.xlu1 %3112, %v2479_v18   ;;  %2525 = vperm.xlu0 %3111, %v2480_v19   ;;  %v3169_v18 = vld [vmem:[%s4229_s1 + $0x88] ss:$16 sps:$4 sm:$0xff]   ;;  %v3170_v19 = vld [vmem:[%s4229_s1 + $0xa0] ss:$16 sps:$4 sm:$0xff]  }
 0x47c   :  { %2530 = vperm.xlu1 %3112, %v2481_v20   ;;  %2535 = vperm.xlu0 %3111, %v2482_v21   ;;  %v3171_v20 = vld [vmem:[%s4229_s1 + $0xac] ss:$16 sps:$4 sm:$0xff]   ;;  %v3173_v21 = vld [vmem:[%s4229_s1 + $0xc4] ss:$16 sps:$4 sm:$0xff]  }
 0x480   :  { %2692 = vperm.xlu1 %3112, %v2688_v22   ;;  %2697 = vperm.xlu0 %3111, %v2689_v23   ;;  %v3175_v22 = vld [vmem:[%s4229_s1 + $0xa8] ss:$16 sps:$4 sm:$0xff]   ;;  %v3176_v23 = vld [vmem:[%s4229_s1 + $0xc0] ss:$16 sps:$4 sm:$0xff]  }
 0x48e   :  { %v1866_v26 = vpop.permute.xlu0 %1865 }
 0x48f   :  { %1868 = vst.msk [vmem:[#allocation4 + $0x40] sm:$0xff] %vm1834_vm5, %v1866_v26  ;;  %v3177_v26 = vld [vmem:[%s4229_s1 + $0xcc] ss:$16 sps:$4 sm:$0xff]  }
 0x492   :  { %v1896_v28 = vpop.permute.xlu1 %1895  ;;  %v1870_v31 = vpop.permute.xlu0 %1869 }
 0x493   :  { %1898 = vst.msk [vmem:[#allocation4 + $0x80] sm:$0xff] %vm1834_vm5, %v1896_v28  ;;  %1872 = vst.msk [vmem:[#allocation4 + $0x48] sm:$0xff] %vm1834_vm5, %v1870_v31  ;;  %v3179_v28 = vld [vmem:[%s4229_s1 + $0xe4] ss:$16 sps:$4 sm:$0xff]   ;;  %v3181_v31 = vld [vmem:[%s4229_s1 + $0xc8] ss:$16 sps:$4 sm:$0xff]  }
 0x496   :  { %v1838_v35 = vpop.permute.xlu1 %1837  ;;  %v1900_v25 = vpop.permute.xlu0 %1899  ;;  %v1969_v37 = vld [vmem:[#allocation4 + $0x40] sm:$0xff] }
 0x497   :  { %1840 = vst.msk [vmem:[#allocation4 + $0x8] sm:$0xff] %vm1834_vm5, %v1838_v35  ;;  %1902 = vst.msk [vmem:[#allocation4 + $0x88] sm:$0xff] %vm1834_vm5, %v1900_v25  ;;  %2932 = vmatprep.subr.bf16.mxu1 %v1969_v37  ;;  %v3182_v35 = vld [vmem:[%s4229_s1 + $0xe0] ss:$16 sps:$4 sm:$0xff]   ;;  %v3183_v25 = vld [vmem:[%s4229_s1 + $0xec] ss:$16 sps:$4 sm:$0xff]  }
 0x498   :  { %2933 = vmatpush3.bf16.msra.mxu1 %v1961_v24  ;;  %v3185_v37 = vld [vmem:[%s4229_s1 + $0x104] ss:$16 sps:$4 sm:$0xff]  }
 0x499   :  { %v1959_v24 = vld [vmem:[%s4229_s1 + $0x120] sm:$0xff] }
 0x49a   :  { %v1874_v40 = vpop.permute.xlu1 %1873  ;;  %v1842_v32 = vpop.permute.xlu0 %1841  ;;  %v1970_v33 = vld [vmem:[#allocation4 + $0x48] sm:$0xff]  ;;  %v1977_v42 = vld [vmem:[#allocation4 + $0x80] sm:$0xff] }
 0x49b   :  { %1876 = vst.msk [vmem:[#allocation4 + $0x50] sm:$0xff] %vm1834_vm5, %v1874_v40  ;;  %1844 = vst.msk [vmem:[#allocation4 + $0x10] sm:$0xff] %vm1834_vm5, %v1842_v32  ;;  %2934 = vmatprep.subr.bf16.mxu1 %v1970_v33  ;;  %2343 = vmatpush1.bf16.msra.mxu0 %v1977_v42  ;;  %v3187_v40 = vld [vmem:[%s4229_s1 + $0xe8] ss:$16 sps:$4 sm:$0xff]   ;;  %v3188_v32 = vld [vmem:[%s4229_s1 + $0x100] ss:$16 sps:$4 sm:$0xff]   ;;  %v2885_v42 = vcombine.high %v1959_v24, %v1959_v24 }
 0x49c   :  { %2344 = vmatprep.subr.bf16.mxu0 %v3203_v3  ;;  %v3189_v33 = vld [vmem:[%s4229_s1 + $0x10c] ss:$16 sps:$4 sm:$0xff]  }
 0x49e   :  { %v1904_v43 = vpop.permute.xlu1 %1903  ;;  %v1878_v45 = vpop.permute.xlu0 %1877  ;;  %v1962_v47 = vld [vmem:[#allocation4 + $0x8] sm:$0xff] }
 0x49f   :  { %v1978_v50 = vld [vmem:[#allocation4 + $0x88] sm:$0xff]  ;;  %1906 = vst.msk [vmem:[#allocation4 + $0x90] sm:$0xff] %vm1834_vm5, %v1904_v43  ;;  %1880 = vst.msk [vmem:[#allocation4 + $0x58] sm:$0xff] %vm1834_vm5, %v1878_v45  ;;  %2935 = vmatpush3.bf16.msra.mxu1 %v1962_v47  ;;  %v1960_v43 = vld [vmem:[%s4229_s1 + $0x128] sm:$0xff]  ;;  %v2884_v47 = vcombine.low %v1959_v24, %v1959_v24 }
 0x4a0   :  { %2345 = vmatpush1.bf16.msra.mxu0 %v1978_v50  ;;  %v3192_v45 = vld [vmem:[%s4229_s1 + $0x108] ss:$16 sps:$4 sm:$0xff]   ;;  %v2887_v50 = vcombine.high %v1960_v43, %v1960_v43 }
 0x4a1   :  { %2346 = vmatprep.subr.bf16.mxu0 %v3203_v3 }
 0x4a2   :  { %v1846_v51 = vpop.permute.xlu1 %1845  ;;  %v1908_v30 = vpop.permute.xlu0 %1907  ;;  %v1971_v29 = vld [vmem:[#allocation4 + $0x50] sm:$0xff] }
 0x4a3   :  { %v1963_v53 = vld [vmem:[#allocation4 + $0x10] sm:$0xff]  ;;  %1848 = vst.msk [vmem:[#allocation4 + $0x18] sm:$0xff] %vm1834_vm5, %v1846_v51  ;;  %1910 = vst.msk [vmem:[#allocation4 + $0x98] sm:$0xff] %vm1834_vm5, %v1908_v30  ;;  %2936 = vmatprep.subr.bf16.mxu1 %v1971_v29  ;;  %v2886_v51 = vcombine.low %v1960_v43, %v1960_v43  ;;  %v3196_v30 = vld [vmem:[%s4229_s1 + $0x140] ss:$16 sps:$4 sm:$0xff]  }
 0x4a4   :  { %2937 = vmatpush3.bf16.msra.mxu1 %v1963_v53 }
 0x4a6   :  { %v1882_v55 = vpop.permute.xlu1 %1881  ;;  %v1850_v39 = vpop.permute.xlu0 %1849  ;;  %v1972_v41 = vld [vmem:[#allocation4 + $0x58] sm:$0xff]  ;;  %v1979_v57 = vld [vmem:[#allocation4 + $0x90] sm:$0xff] }
 0x4a7   :  { %1884 = vst.msk [vmem:[#allocation4 + $0x60] sm:$0xff] %vm1834_vm5, %v1882_v55  ;;  %1852 = vst.msk [vmem:[#allocation4 + $0x20] sm:$0xff] %vm1834_vm5, %v1850_v39  ;;  %2938 = vmatprep.subr.bf16.mxu1 %v1972_v41  ;;  %2347 = vmatpush1.bf16.msra.mxu0 %v1979_v57 }
 0x4a8   :  { %2348 = vmatprep.subr.bf16.mxu0 %v3203_v3 }
 0x4aa   :  { %v1912_v58 = vpop.permute.xlu1 %1911  ;;  %v1886_v59 = vpop.permute.xlu0 %1885  ;;  %v1964_v34 = vld [vmem:[#allocation4 + $0x18] sm:$0xff] }
 0x4ab   :  { %v1980_v36 = vld [vmem:[#allocation4 + $0x98] sm:$0xff]  ;;  %1914 = vst.msk [vmem:[#allocation4 + $0xa0] sm:$0xff] %vm1834_vm5, %v1912_v58  ;;  %1888 = vst.msk [vmem:[#allocation4 + $0x68] sm:$0xff] %vm1834_vm5, %v1886_v59  ;;  %2939 = vmatpush3.bf16.msra.mxu1 %v1964_v34 }
 0x4ac   :  { %2349 = vmatpush1.bf16.msra.mxu0 %v1980_v36 }
 0x4ad   :  { %2350 = vmatprep.subr.bf16.mxu0 %v3203_v3 }
 0x4ae   :  { %v1854_v60 = vpop.permute.xlu1 %1853  ;;  %v1916_v48 = vpop.permute.xlu0 %1915  ;;  %v1973_v49 = vld [vmem:[#allocation4 + $0x60] sm:$0xff] }
 0x4af   :  { %v1965_v61 = vld [vmem:[#allocation4 + $0x20] sm:$0xff]  ;;  %1856 = vst.msk [vmem:[#allocation4 + $0x28] sm:$0xff] %vm1834_vm5, %v1854_v60  ;;  %1918 = vst.msk [vmem:[#allocation4 + $0xa8] sm:$0xff] %vm1834_vm5, %v1916_v48  ;;  %2940 = vmatprep.subr.bf16.mxu1 %v1973_v49 }
 0x4b0   :  { %2941 = vmatpush3.bf16.msra.mxu1 %v1965_v61 }
 0x4b2   :  { %v1858_v62 = vpop.permute.xlu1 %1857  ;;  %v1920_v63 = vpop.permute.xlu0 %1919  ;;  %v1974_v16 = vld [vmem:[#allocation4 + $0x68] sm:$0xff]  ;;  %v1981_v0 = vld [vmem:[#allocation4 + $0xa0] sm:$0xff] }
 0x4b3   :  { %1860 = vst.msk [vmem:[#allocation4 + $0x30] sm:$0xff] %vm1834_vm5, %v1858_v62  ;;  %1922 = vst.msk [vmem:[#allocation4 + $0xb0] sm:$0xff] %vm1834_vm5, %v1920_v63  ;;  %2942 = vmatprep.subr.bf16.mxu1 %v1974_v16  ;;  %2351 = vmatpush1.bf16.msra.mxu0 %v1981_v0 }
 0x4b4   :  { %2352 = vmatprep.subr.bf16.mxu0 %v3203_v3 }
 0x4b6   :  { %v1892_v46 = vpop.permute.xlu1 %1891  ;;  %v1862_v44 = vpop.permute.xlu0 %1861  ;;  %v1966_v1 = vld [vmem:[#allocation4 + $0x28] sm:$0xff] }
 0x4b7   :  { %v1982_v17 = vld [vmem:[#allocation4 + $0xa8] sm:$0xff]  ;;  %1894 = vst.msk [vmem:[#allocation4 + $0x78] sm:$0xff] %vm1834_vm5, %v1892_v46  ;;  %1864 = vst.msk [vmem:[#allocation4 + $0x38] sm:$0xff] %vm1834_vm5, %v1862_v44  ;;  %2943 = vmatpush3.bf16.msra.mxu1 %v1966_v1 }
 0x4b8   :  { %2353 = vmatpush1.bf16.msra.mxu0 %v1982_v17  ;;  %2944 = vmatprep.subr.bf16.mxu1 %v1975_v2 }
 0x4b9   :  { %2354 = vmatprep.subr.bf16.mxu0 %v3203_v3 }
 0x4ba   :  { %v1924_v4 = vpop.permute.xlu1 %1923  ;;  %v1928_v5 = vpop.permute.xlu0 %1927  ;;  %v1967_v38 = vld [vmem:[#allocation4 + $0x30] sm:$0xff] }
 0x4bb   :  { %v1983_v6 = vld [vmem:[#allocation4 + $0xb0] sm:$0xff]  ;;  %1926 = vst.msk [vmem:[#allocation4 + $0xb8] sm:$0xff] %vm1834_vm5, %v1924_v4  ;;  %1930 = vst.msk [vmem:[#allocation4 + $0xc0] sm:$0xff] %vm1834_vm5, %v1928_v5  ;;  %2945 = vmatpush3.bf16.msra.mxu1 %v1967_v38 }
 0x4bc   :  { %2355 = vmatpush1.bf16.msra.mxu0 %v1983_v6 }
 0x4bd   :  { %2356 = vmatprep.subr.bf16.mxu0 %v3203_v3 }
 0x4be   :  { %v1976_v54 = vld [vmem:[#allocation4 + $0x78] sm:$0xff] }
 0x4bf   :  { %v1968_v52 = vld [vmem:[#allocation4 + $0x38] sm:$0xff]  ;;  %2946 = vmatprep.subr.bf16.mxu1 %v1976_v54 }
 0x4c0   :  { %2947 = vmatpush3.bf16.msra.mxu1 %v1968_v52 }
 0x4c2   :  { %v1984_v10 = vld [vmem:[#allocation4 + $0xb8] sm:$0xff]  ;;  %v1985_v27 = vld [vmem:[#allocation4 + $0xc0] sm:$0xff] }
 0x4c3   :  { %2279 = vmatmul.mubr.bf16.vlgmr.msra.gmra.mrb[24].mxu1 %v3150_v7  ;;  %2357 = vmatpush1.bf16.msra.mxu0 %v1984_v10 }
 0x4c4   :  { %2358 = vmatprep.subr.bf16.mxu0 %v3203_v3  ;;  %2286 = vmatprep.mubr.bf16.mxu1 %v3155_v8  ;;  %v3163_v3 = vld [vmem:[%s4229_s1 + $0x68] ss:$16 sps:$4 sm:$0xff]  }
 0x4c7   :  { %2359 = vmatpush1.bf16.msra.mxu0 %v1985_v27 }
 0x4ca   :  { %2375 = vmatmul.mubr.bf16.vlgmr.msra.gmra.mrb[20].mxu0 %v3157_v11 }
 0x4cb   :  { %2287 = vmatmul.mubr.bf16.gmra.mrb[28].mxu1 %v3158_v12  ;;  %2889 = vmatprep.mubr.msk.bf16.mxu0 %vm951_vm3, %v3159_v9  ;;  %v2004_v58 = vpop.permute.xlu1 %2003  ;;  %v2009_v34 = vpop.permute.xlu0 %2008 }
 0x4cc   :  { %2294 = vmatprep.mubr.bf16.mxu1 %v3161_v13 }
 0x4cf   :  { %v2014_v5 = vpop.permute.xlu1 %2013  ;;  %v2019_v54 = vpop.permute.xlu0 %2018 }
 0x4d2   :  { %2383 = vmatmul.mubr.bf16.gmra.mrb[24].mxu0 %v3163_v3 }
 0x4d3   :  { %2295 = vmatmul.mubr.bf16.gmra.mrb[32].mxu1 %v3164_v14  ;;  %2890 = vmatprep.mubr.msk.bf16.mxu0 %vm951_vm3, %v3165_v15 }
 0x4d4   :  { %2302 = vmatprep.mubr.bf16.mxu1 %v3167_v56 }
 0x4da   :  { %2391 = vmatmul.mubr.bf16.gmra.mrb[28].mxu0 %v3169_v18 }
 0x4db   :  { %2303 = vmatmul.mubr.bf16.gmra.mrb[36].mxu1 %v3170_v19  ;;  %2891 = vmatprep.mubr.msk.bf16.mxu0 %vm951_vm3, %v3171_v20  ;;  %v2024_v20 = vpop.permute.xlu1 %2023 }
 0x4dc   :  { %2310 = vmatprep.mubr.bf16.mxu1 %v3173_v21 }
 0x4e2   :  { %2399 = vmatmul.mubr.bf16.gmra.mrb[32].mxu0 %v3175_v22 }
 0x4e3   :  { %2311 = vmatmul.mubr.bf16.gmra.mrb[40].mxu1 %v3176_v23  ;;  %2892 = vmatprep.mubr.msk.bf16.mxu0 %vm951_vm3, %v3177_v26  ;;  %v2029_v23 = vpop.permute.xlu0 %2028 }
 0x4e4   :  { %2318 = vmatprep.mubr.bf16.mxu1 %v3179_v28 }
 0x4ea   :  { %2407 = vmatmul.mubr.bf16.gmra.mrb[36].mxu0 %v3181_v31 }
 0x4eb   :  { %2319 = vmatmul.mubr.bf16.gmra.mrb[44].mxu1 %v3182_v35  ;;  %2893 = vmatprep.mubr.msk.bf16.mxu0 %vm951_vm3, %v3183_v25 }
 0x4ec   :  { %2326 = vmatprep.mubr.bf16.mxu1 %v3185_v37 }
 0x4f2   :  { %2415 = vmatmul.mubr.bf16.gmra.mrb[40].mxu0 %v3187_v40 }
 0x4f3   :  { %2327 = vmatmul.mubr.bf16.gmra.mrb[48].mxu1 %v3188_v32  ;;  %2894 = vmatprep.mubr.msk.bf16.mxu0 %vm951_vm3, %v3189_v33 }
 0x4f4   :  { %2334 = vmatprep.mubr.bf16.mxu1 %v2885_v42 }
 0x4fa   :  { %2423 = vmatmul.mubr.bf16.gmra.mrb[44].mxu0 %v3192_v45 }
 0x4fb   :  { %2335 = vmatmul.mubr.bf16.gmra.mrb[52].mxu1 %v2884_v47  ;;  %2895 = vmatprep.mubr.msk.bf16.mxu0 %vm951_vm3, %v2887_v50  ;;  %vm2585_vm3 = vcmask 1043456  }
 0x4fc   :  { %3033 = vmatprep.mubr.msk.bf16.mxu1 %vm1028_vm8, %v3196_v30 }
 0x502   :  { %2431 = vmatmul.mubr.bf16.gmra.mrb[48].mxu0 %v2886_v51  ;;  %v2034_v51 = vpop.permute.xlu1 %2033 }
 0x596   :  { %v2948_v29 = vpop.f32.mrb[24].mxu1 }
 0x597   :  { %v2949_v53 = vpop.f32.mrb[25].mxu1 }
 0x598   :  { %v2950_v55 = vadd.f32 %v2949_v53, %v2948_v29  ;;  %v2951_v39 = vpop.f32.mrb[26].mxu1  ;;  %v2039_v53 = vpop.permute.xlu0 %2038 }
 0x599   :  { %v2952_v41 = vpop.f32.mrb[27].mxu1 }
 0x59a   :  { %v2953_v57 = vadd.f32 %v2952_v41, %v2951_v39  ;;  %v2281_v59 = vadd.f32 %v2950_v55, %v2004_v58 }
 0x59c   :  { %v2284_v61 = vadd.f32 %v2953_v57, %v2009_v34 }
 0x59d   :  { %v2376_v36 = vpop.f32.mrb[20].mxu0 }
 0x59e   :  { %v2377_v60 = vadd.f32 %v2376_v36, %v2281_v59  ;;  %v2954_v48 = vpop.f32.mrb[28].mxu1  ;;  %v2378_v49 = vpop.f32.mrb[21].mxu0 }
 0x59f   :  { %v2955_v62 = vpop.f32.mrb[29].mxu1  ;;  %v2379_v63 = vpop.f32.mrb[22].mxu0 }
 0x5a0   :  { %v2956_v16 = vadd.f32 %v2955_v62, %v2954_v48  ;;  %v2380_v0 = vadd.f32 %v2379_v63, %v2284_v61  ;;  %v2957_v46 = vpop.f32.mrb[30].mxu1  ;;  %v2381_v44 = vpop.f32.mrb[23].mxu0  ;;  %v2438_v17 = vmax.f32 %v2377_v60, 0.0 }
 0x5a1   :  { %v2958_v1 = vpop.f32.mrb[31].mxu1 }
 0x5a2   :  { %v2439_v2 = vmax.f32 %v2380_v0, 0.0  ;;  %v2959_v4 = vadd.f32 %v2958_v1, %v2957_v46  ;;  %v2289_v6 = vadd.f32 %v2956_v16, %v2014_v5  ;;  %v2044_v0 = vpop.permute.xlu1 %2043  ;;  %v2049_v1 = vpop.permute.xlu0 %2048 }
 0x5a4   :  { %v2464_v38 = vpack.c.bf16 %v2439_v2, %v2438_v17  ;;  %v2292_v27 = vadd.f32 %v2959_v4, %v2019_v54 }
 0x5a5   :  { %v2384_v52 = vpop.f32.mrb[24].mxu0 }
 0x5a6   :  { %v2385_v7 = vadd.f32 %v2384_v52, %v2289_v6  ;;  %v2960_v8 = vpop.f32.mrb[32].mxu1  ;;  %v2386_v10 = vpop.f32.mrb[25].mxu0  ;;  %3017 = vmatprep.subr.bf16.mxu1 %v2464_v38 }
 0x5a7   :  { %v2961_v11 = vpop.f32.mrb[33].mxu1  ;;  %v2387_v12 = vpop.f32.mrb[26].mxu0  ;;  %3018 = vmatpush3.bf16.msra.mxu1 %v2464_v38 }
 0x5a8   :  { %v2962_v9 = vadd.f32 %v2961_v11, %v2960_v8  ;;  %v2388_v13 = vadd.f32 %v2387_v12, %v2292_v27  ;;  %v2963_v3 = vpop.f32.mrb[34].mxu1  ;;  %v2389_v14 = vpop.f32.mrb[27].mxu0  ;;  %v2440_v56 = vmax.f32 %v2385_v7, 0.0 }
 0x5a9   :  { %v2964_v15 = vpop.f32.mrb[35].mxu1 }
 0x5aa   :  { %v2441_v18 = vmax.f32 %v2388_v13, 0.0  ;;  %v2965_v19 = vadd.f32 %v2964_v15, %v2963_v3  ;;  %v2297_v22 = vadd.f32 %v2962_v9, %v2024_v20  ;;  %v2054_v13 = vpop.permute.xlu1 %2053  ;;  %v2059_v15 = vpop.permute.xlu0 %2058 }
 0x5ac   :  { %v2465_v21 = vpack.c.bf16 %v2441_v18, %v2440_v56  ;;  %v2300_v25 = vadd.f32 %v2965_v19, %v2029_v23 }
 0x5ad   :  { %v2392_v26 = vpop.f32.mrb[28].mxu0 }
 0x5ae   :  { %v2393_v28 = vadd.f32 %v2392_v26, %v2297_v22  ;;  %v2966_v31 = vpop.f32.mrb[36].mxu1  ;;  %v2394_v35 = vpop.f32.mrb[29].mxu0  ;;  %3019 = vmatprep.subr.bf16.mxu1 %v2465_v21 }
 0x5af   :  { %v2967_v37 = vpop.f32.mrb[37].mxu1  ;;  %v2395_v24 = vpop.f32.mrb[30].mxu0  ;;  %3020 = vmatpush3.bf16.msra.mxu1 %v2465_v21 }
 0x5b0   :  { %v2968_v40 = vadd.f32 %v2967_v37, %v2966_v31  ;;  %v2396_v32 = vadd.f32 %v2395_v24, %v2300_v25  ;;  %v2969_v33 = vpop.f32.mrb[38].mxu1  ;;  %v2397_v42 = vpop.f32.mrb[31].mxu0  ;;  %v2442_v45 = vmax.f32 %v2393_v28, 0.0 }
 0x5b1   :  { %v2970_v43 = vpop.f32.mrb[39].mxu1 }
 0x5b2   :  { %v2443_v47 = vmax.f32 %v2396_v32, 0.0  ;;  %v2971_v50 = vadd.f32 %v2970_v43, %v2969_v33  ;;  %v2305_v29 = vadd.f32 %v2968_v40, %v2034_v51  ;;  %v2064_v32 = vpop.permute.xlu1 %2063  ;;  %v2069_v43 = vpop.permute.xlu0 %2068 }
 0x5b4   :  { %v2466_v30 = vpack.c.bf16 %v2443_v47, %v2442_v45  ;;  %v2308_v58 = vadd.f32 %v2971_v50, %v2039_v53 }
 0x5b5   :  { %v2400_v55 = vpop.f32.mrb[32].mxu0 }
 0x5b6   :  { %v2401_v39 = vadd.f32 %v2400_v55, %v2305_v29  ;;  %v2972_v41 = vpop.f32.mrb[40].mxu1  ;;  %v2402_v57 = vpop.f32.mrb[33].mxu0  ;;  %3021 = vmatprep.subr.bf16.mxu1 %v2466_v30 }
 0x5b7   :  { %v2973_v59 = vpop.f32.mrb[41].mxu1  ;;  %v2403_v34 = vpop.f32.mrb[34].mxu0  ;;  %3022 = vmatpush3.bf16.msra.mxu1 %v2466_v30 }
 0x5b8   :  { %v2974_v36 = vadd.f32 %v2973_v59, %v2972_v41  ;;  %v2404_v60 = vadd.f32 %v2403_v34, %v2308_v58  ;;  %v2975_v48 = vpop.f32.mrb[42].mxu1  ;;  %v2405_v49 = vpop.f32.mrb[35].mxu0  ;;  %v2444_v62 = vmax.f32 %v2401_v39, 0.0 }
 0x5b9   :  { %v2976_v61 = vpop.f32.mrb[43].mxu1 }
 0x5ba   :  { %v2445_v63 = vmax.f32 %v2404_v60, 0.0  ;;  %v2977_v16 = vadd.f32 %v2976_v61, %v2975_v48  ;;  %v2313_v44 = vadd.f32 %v2974_v36, %v2044_v0  ;;  %v2074_v36 = vpop.permute.xlu1 %2073 }
 0x5bc   :  { %v2467_v46 = vpack.c.bf16 %v2445_v63, %v2444_v62  ;;  %v2316_v38 = vadd.f32 %v2977_v16, %v2049_v1  ;;  %v3197_v1 = vld [vmem:[%s4229_s1 + $0x160] ss:$16 sps:$4 sm:$0xff]  }
 0x5bd   :  { %v2408_v17 = vpop.f32.mrb[36].mxu0 }
 0x5be   :  { %v2409_v2 = vadd.f32 %v2408_v17, %v2313_v44  ;;  %v2978_v4 = vpop.f32.mrb[44].mxu1  ;;  %v2410_v5 = vpop.f32.mrb[37].mxu0  ;;  %3023 = vmatprep.subr.bf16.mxu1 %v2467_v46  ;;  %v3198_v17 = vld [vmem:[%s4229_s1 + $0x180] ss:$16 sps:$4 sm:$0xff]  }
 0x5bf   :  { %v2979_v6 = vpop.f32.mrb[45].mxu1  ;;  %v2411_v54 = vpop.f32.mrb[38].mxu0  ;;  %3024 = vmatpush3.bf16.msra.mxu1 %v2467_v46  ;;  %v3201_v5 = vld [vmem:[%s4229_s1 + $0x1e0] ss:$0 sps:$4 sm:$0x33]  }
 0x5c0   :  { %v2980_v52 = vadd.f32 %v2979_v6, %v2978_v4  ;;  %v2412_v7 = vadd.f32 %v2411_v54, %v2316_v38  ;;  %v2981_v8 = vpop.f32.mrb[46].mxu1  ;;  %v2413_v10 = vpop.f32.mrb[39].mxu0  ;;  %v2446_v11 = vmax.f32 %v2409_v2, 0.0  ;;  %v3199_v2 = vld [vmem:[%s4229_s1 + $0x1a0] ss:$16 sps:$4 sm:$0xff]   ;;  %v3242_v38 = vmov 0.0  }
 0x5c1   :  { %v2982_v27 = vpop.f32.mrb[47].mxu1  ;;  %v3200_v4 = vld [vmem:[%s4229_s1 + $0x1c0] ss:$16 sps:$4 sm:$0xff]   ;;  %v2486_v6 = vpop.permute.xlu0 %2485 }
 0x5c2   :  { %v2447_v12 = vmax.f32 %v2412_v7, 0.0  ;;  %v2983_v9 = vadd.f32 %v2982_v27, %v2981_v8  ;;  %v2321_v14 = vadd.f32 %v2980_v52, %v2054_v13  ;;  %v2491_v54 = vpop.permute.xlu1 %2490 }
 0x5c4   :  { %v2468_v3 = vpack.c.bf16 %v2447_v12, %v2446_v11  ;;  %v2324_v21 = vadd.f32 %v2983_v9, %v2059_v15 }
 0x5c5   :  { %v2416_v56 = vpop.f32.mrb[40].mxu0  ;;  %v2496_v52 = vpop.permute.xlu0 %2495 }
 0x5c6   :  { %v2417_v18 = vadd.f32 %v2416_v56, %v2321_v14  ;;  %v2984_v19 = vpop.f32.mrb[48].mxu1  ;;  %v2418_v20 = vpop.f32.mrb[41].mxu0  ;;  %3025 = vmatprep.subr.bf16.mxu1 %v2468_v3 }
 0x5c7   :  { %v2985_v22 = vpop.f32.mrb[49].mxu1  ;;  %v2419_v23 = vpop.f32.mrb[42].mxu0  ;;  %3026 = vmatpush3.bf16.msra.mxu1 %v2468_v3 }
 0x5c8   :  { %v2986_v26 = vadd.f32 %v2985_v22, %v2984_v19  ;;  %v2420_v28 = vadd.f32 %v2419_v23, %v2324_v21  ;;  %v2987_v31 = vpop.f32.mrb[50].mxu1  ;;  %v2421_v35 = vpop.f32.mrb[43].mxu0  ;;  %v2448_v37 = vmax.f32 %v2417_v18, 0.0 }
 0x5c9   :  { %v2988_v25 = vpop.f32.mrb[51].mxu1  ;;  %v2501_v7 = vpop.permute.xlu1 %2500 }
 0x5ca   :  { %v2449_v24 = vmax.f32 %v2420_v28, 0.0  ;;  %v2989_v40 = vadd.f32 %v2988_v25, %v2987_v31  ;;  %v2329_v42 = vadd.f32 %v2986_v26, %v2064_v32  ;;  %v2506_v8 = vpop.permute.xlu0 %2505 }
 0x5cc   :  { %v2469_v33 = vpack.c.bf16 %v2449_v24, %v2448_v37  ;;  %v2332_v30 = vadd.f32 %v2989_v40, %v2069_v43 }
 0x5cd   :  { %v2424_v45 = vpop.f32.mrb[44].mxu0  ;;  %v2511_v13 = vpop.permute.xlu1 %2510 }
 0x5ce   :  { %v2425_v47 = vadd.f32 %v2424_v45, %v2329_v42  ;;  %v2990_v50 = vpop.f32.mrb[52].mxu1  ;;  %v2426_v51 = vpop.f32.mrb[45].mxu0  ;;  %3027 = vmatprep.subr.bf16.mxu1 %v2469_v33 }
 0x5cf   :  { %v2991_v29 = vpop.f32.mrb[53].mxu1  ;;  %v2427_v53 = vpop.f32.mrb[46].mxu0  ;;  %3028 = vmatpush3.bf16.msra.mxu1 %v2469_v33 }
 0x5d0   :  { %v2992_v55 = vadd.f32 %v2991_v29, %v2990_v50  ;;  %v2428_v39 = vadd.f32 %v2427_v53, %v2332_v30  ;;  %v2429_v41 = vpop.f32.mrb[47].mxu0  ;;  %v2993_v57 = vpop.f32.mrb[54].mxu1  ;;  %v2450_v59 = vmax.f32 %v2425_v47, 0.0 }
 0x5d1   :  { %v2994_v58 = vpop.f32.mrb[55].mxu1  ;;  %v2516_v15 = vpop.permute.xlu0 %2515 }
 0x5d2   :  { %v2451_v34 = vmax.f32 %v2428_v39, 0.0  ;;  %v2337_v48 = vadd.f32 %v2992_v55, %v2074_v36  ;;  %v2521_v28 = vpop.permute.xlu1 %2520 }
 0x5d4   :  { %v2470_v60 = vpack.c.bf16 %v2451_v34, %v2450_v59 }
 0x5d5   :  { %v2432_v49 = vpop.f32.mrb[48].mxu0  ;;  %v2526_v25 = vpop.permute.xlu0 %2525 }
 0x5d6   :  { %v2433_v61 = vadd.f32 %v2432_v49, %v2337_v48  ;;  %v2434_v62 = vpop.f32.mrb[49].mxu0  ;;  %3029 = vmatprep.subr.bf16.mxu1 %v2470_v60  ;;  %v2531_v57 = vpop.permute.xlu1 %2530 }
 0x5d7   :  { %v2435_v63 = vpop.f32.mrb[50].mxu0  ;;  %3030 = vmatpush3.bf16.msra.mxu1 %v2470_v60  ;;  %v3202_v62 = vld [vmem:[%s4229_s1 + $0x200] ss:$16 sps:$4 sm:$0x1f]  }
 0x5d8   :  { %v2452_v16 = vmax.f32 %v2433_v61, 0.0  ;;  %v2436_v0 = vpop.f32.mrb[51].mxu0 }
 0x5d9   :  { %v2536_v51 = vpop.permute.xlu0 %2535 }
 0x5da   :  { %v2471_v46 = vpack.c.bf16 %v2452_v16, %v2452_v16  ;;  %v2693_v63 = vpop.permute.xlu1 %2692 }
 0x5dc   :  { %3069 = vmatprep.subr.msk.bf16.mxu1 %vm2585_vm3, %v2471_v46  ;;  %v2587_v44 = vsel %vm2585_vm3, %v2471_v46, 0 }
 0x5dd   :  { %3032 = vmatpush3.bf16.msra.mxu1 %v2587_v44  ;;  %v2698_v44 = vpop.permute.xlu0 %2697 }
 0x5de   :  { %3045 = vmatprep.subr.bf16.mxu1 %v3242_v38 }
 0x5e0   :  { %3034 = vmatmul.mubr.msk.bf16.vlgmr.msra.gmra.mrb[56].mxu1 %vm1028_vm8, %v3197_v1 }
 0x5e1   :  { %3037 = vmatprep.mubr.msk.bf16.mxu1 %vm1028_vm8, %v3198_v17 }
 0x5e8   :  { %3038 = vmatmul.mubr.msk.bf16.gmra.mrb[60].mxu1 %vm1028_vm8, %v3199_v2 }
 0x5e9   :  { %3041 = vmatprep.mubr.msk.bf16.mxu1 %vm1028_vm8, %v3200_v4 }
 0x5f0   :  { %3042 = vmatmul.mubr.msk.bf16.gmra.mrb[64].mxu1 %vm1028_vm8, %v3201_v5  ;;  %vm2709_vm8 = vcmask 1041408  }
 0x5f1   :  { %3057 = vmatprep.mubr.msk.bf16.mxu1 %vm3243_vm7, %v3242_v38 }
 0x6b3   :  { %v3035_v10 = vpop.f32.mrb[56].mxu1 }
 0x6b4   :  { %v2632_v27 = vadd.f32 %v3035_v10, %v2496_v52  ;;  %v2623_v11 = vpop.f32.mrb[57].mxu1 }
 0x6b5   :  { %v2624_v12 = vadd.f32 %v2623_v11, %v2486_v6  ;;  %v3036_v9 = vpop.f32.mrb[58].mxu1 }
 0x6b6   :  { %v2635_v3 = vadd.f32 %v3036_v9, %v2501_v7  ;;  %v2626_v14 = vpop.f32.mrb[59].mxu1  ;;  %v2671_v18 = vmax.f32 %v2632_v27, 0.0 }
 0x6b7   :  { %v2627_v56 = vadd.f32 %v2626_v14, %v2491_v54  ;;  %v2669_v20 = vmax.f32 %v2624_v12, 0.0 }
 0x6b8   :  { %v2672_v19 = vmax.f32 %v2635_v3, 0.0 }
 0x6b9   :  { %v2670_v21 = vmax.f32 %v2627_v56, 0.0 }
 0x6ba   :  { %v2683_v22 = vpack.c.bf16 %v2672_v19, %v2671_v18 }
 0x6bb   :  { %v2682_v23 = vpack.c.bf16 %v2670_v21, %v2669_v20  ;;  %v3039_v26 = vpop.f32.mrb[60].mxu1 }
 0x6bc   :  { %v2648_v31 = vadd.f32 %v3039_v26, %v2516_v15  ;;  %v2639_v35 = vpop.f32.mrb[61].mxu1 }
 0x6bd   :  { %v2640_v37 = vadd.f32 %v2639_v35, %v2506_v8  ;;  %v3040_v24 = vpop.f32.mrb[62].mxu1  ;;  %3046 = vmatpush3.bf16.msra.mxu1 %v2682_v23 }
 0x6be   :  { %v2651_v40 = vadd.f32 %v3040_v24, %v2521_v28  ;;  %v2642_v32 = vpop.f32.mrb[63].mxu1  ;;  %3047 = vmatprep.subr.bf16.mxu1 %v3242_v38  ;;  %v2675_v42 = vmax.f32 %v2648_v31, 0.0 }
 0x6bf   :  { %v2643_v33 = vadd.f32 %v2642_v32, %v2511_v13  ;;  %v2673_v45 = vmax.f32 %v2640_v37, 0.0 }
 0x6c0   :  { %v2676_v43 = vmax.f32 %v2651_v40, 0.0 }
 0x6c1   :  { %v2674_v47 = vmax.f32 %v2643_v33, 0.0  ;;  %3048 = vmatpush3.bf16.msra.mxu1 %v2683_v22 }
 0x6c2   :  { %v2685_v50 = vpack.c.bf16 %v2676_v43, %v2675_v42  ;;  %3049 = vmatprep.subr.bf16.mxu1 %v3242_v38 }
 0x6c3   :  { %v2684_v30 = vpack.c.bf16 %v2674_v47, %v2673_v45  ;;  %v3043_v29 = vpop.f32.mrb[64].mxu1 }
 0x6c4   :  { %v2664_v53 = vadd.f32 %v3043_v29, %v2536_v51  ;;  %v2655_v55 = vpop.f32.mrb[65].mxu1 }
 0x6c5   :  { %v2656_v39 = vadd.f32 %v2655_v55, %v2526_v25  ;;  %v3044_v41 = vpop.f32.mrb[66].mxu1  ;;  %3050 = vmatpush3.bf16.msra.mxu1 %v2684_v30 }
 0x6c6   :  { %v2658_v58 = vpop.f32.mrb[67].mxu1  ;;  %3051 = vmatprep.subr.bf16.mxu1 %v3242_v38  ;;  %v2679_v34 = vmax.f32 %v2664_v53, 0.0 }
 0x6c7   :  { %v2659_v59 = vadd.f32 %v2658_v58, %v2531_v57  ;;  %v2677_v36 = vmax.f32 %v2656_v39, 0.0 }
 0x6c8   :  { %v2687_v49 = vpack.c.bf16 %v2679_v34, %v2679_v34 }
 0x6c9   :  { %v2678_v60 = vmax.f32 %v2659_v59, 0.0  ;;  %3052 = vmatpush3.bf16.msra.mxu1 %v2685_v50 }
 0x6ca   :  { %3053 = vmatprep.subr.bf16.mxu1 %v3242_v38  ;;  %v2711_v61 = vsel %vm2709_vm8, %v2687_v49, 0 }
 0x6cb   :  { %v2686_v48 = vpack.c.bf16 %v2678_v60, %v2677_v36 }
 0x6cd   :  { %3054 = vmatpush3.bf16.msra.mxu1 %v2686_v48 }
 0x6ce   :  { %3055 = vmatprep.subr.bf16.mxu1 %v3242_v38 }
 0x6d1   :  { %3056 = vmatpush3.bf16.msra.mxu1 %v2711_v61 }
 0x6d4   :  { %3058 = vmatmul.mubr.msk.bf16.vlgmr.msra.gmra.mrb[68].mxu1 %vm2705_vm15, %v3202_v62 }
 0x7a7   :  { %v2747_v16 = vpop.f32.mrb[68].mxu1 }
 0x7a8   :  { %v2748_v0 = vadd.f32 %v2747_v16, %v2693_v63  ;;  %v3059_v46 = vpop.f32.mrb[69].mxu1 }
 0x7a9   :  { %v2750_v1 = vpop.f32.mrb[70].mxu1 }
 0x7aa   :  { %2754 = vst.msk [vmem:[%s4231_s3] sm:$0xff] %vm1834_vm5, %v2748_v0  ;;  %v2751_v17 = vadd.f32 %v2750_v1, %v2698_v44  ;;  %v3060_v2 = vpop.f32.mrb[71].mxu1 }
 0x7ac   :  { %2756 = vst.msk [vmem:[%s4231_s3 + $0x8] sm:$0x3] %vm2755_vm0, %v2751_v17 }

</bundles_post_ra>
